<compile_context>
chip_gen: v5e
topology: v5e:2x2
jax: 0.10.0
libtpu: 0.0.40
codegen_flags: <defaults>
</compile_context>

<pallas_src>
import functools
import math

import jax
import jax.numpy as jnp
import numpy as np
from jax.experimental import pallas as pl
from jax.experimental.pallas import tpu as pltpu


# ---------------------------------------------------------------------------
# Fused kernel: one grid step == one batch element's full sequence.
# ---------------------------------------------------------------------------
def _fused_attn_kernel(x_ref, wq_ref, bq_ref, wk_ref, bk_ref, wv_ref, bv_ref,
                       wo_ref, y_ref, *, n_heads, d_k, d_v):
  x = x_ref[0]                                          # (T, D) bf16
  T = x.shape[0]

  def proj(w_ref, b_ref):
    o = jnp.dot(x, w_ref[...], preferred_element_type=jnp.float32)
    return (o + b_ref[...]).astype(jnp.bfloat16)        # f32 acc, bf16 result

  q = proj(wq_ref, bq_ref)                              # (T, H*d_k); 1/sqrt(d_k)
  k = proj(wk_ref, bk_ref)                              # already folded into Wq/bq
  v = proj(wv_ref, bv_ref)                              # (T, H*d_v)

  # Additive causal mask: large finite negative (diagonal always unmasked, so
  # the max-subtracted softmax has no inf/NaN hazard).
  row = jax.lax.broadcasted_iota(jnp.int32, (T, T), 0)
  col = jax.lax.broadcasted_iota(jnp.int32, (T, T), 1)
  neg = jnp.where(col <= row, jnp.float32(0.0), jnp.float32(-1e30))

  heads = []
  for h in range(n_heads):                              # static lane slices
    qh = q[:, h * d_k:(h + 1) * d_k]                    # (T, d_k)
    kh = k[:, h * d_k:(h + 1) * d_k]
    vh = v[:, h * d_v:(h + 1) * d_v]                    # (T, d_v)

    s = jnp.dot(qh, kh.T, preferred_element_type=jnp.float32) + neg
    m = jnp.max(s, axis=-1, keepdims=True)
    p = jnp.exp(s - m)
    l = jnp.sum(p, axis=-1, keepdims=True)
    oh = jnp.dot(p.astype(jnp.bfloat16), vh,
                 preferred_element_type=jnp.float32)    # (T, d_v) unnormalized
    # Deferred softmax normalization: EUP approx reciprocal on T*d_v elements
    # instead of a T*T normalization of p.
    heads.append((oh * pl.reciprocal(l, approx=True)).astype(jnp.bfloat16))

  attn = jnp.concatenate(heads, axis=-1)                # (T, H*d_v), lane-dense
  y_ref[0] = jnp.dot(attn, wo_ref[...],
                     preferred_element_type=jnp.float32).astype(y_ref.dtype)


# ---------------------------------------------------------------------------
# One-time weight preparation (outside the per-call hot path).
# ---------------------------------------------------------------------------
def prepare_params(params, *, d_k):
  """Compose low-rank pairs in f32, fold 1/sqrt(d_k) into Q, cast to bf16."""
  scale = 1.0 / math.sqrt(d_k)
  bf16 = lambda a: a.astype(jnp.bfloat16)
  return {
      "wq": bf16(params["qw1"] @ params["qw2"] * scale),
      "bq": (params["qb"] * scale).astype(jnp.float32),
      "wk": bf16(params["kw1"] @ params["kw2"]),
      "bk": params["kb"].astype(jnp.float32),
      "wv": bf16(params["vw1"] @ params["vw2"]),
      "bv": params["vb"].astype(jnp.float32),
      "wo": bf16(params["ow1"] @ params["ow2"]),
  }


# ---------------------------------------------------------------------------
# Wrapper: one fused pallas_call, grid over batch elements.
# ---------------------------------------------------------------------------
def attn_forward(x, prepped, *, d_k, d_v, n_heads):
  """x: (B, T, d_model) f32 -> (B, T, d_model) f32."""
  B, T, D = x.shape
  Hk, Hv = n_heads * d_k, n_heads * d_v
  assert prepped["wq"].shape == (D, Hk), (prepped["wq"].shape, (D, Hk))
  assert prepped["wo"].shape == (Hv, D), (prepped["wo"].shape, (Hv, D))

  x_bf = x.astype(jnp.bfloat16)                         # halve the x HBM stream

  def _const(a):
    return pl.BlockSpec(a.shape, lambda b, _n=a.ndim: (0,) * _n)

  xspec = pl.BlockSpec((1, T, D), lambda b: (b, 0, 0))  # lane-dense (D) I/O
  weights = (prepped["wq"], prepped["bq"], prepped["wk"], prepped["bk"],
             prepped["wv"], prepped["bv"], prepped["wo"])

  kernel = functools.partial(_fused_attn_kernel,
                             n_heads=n_heads, d_k=d_k, d_v=d_v)
  return pl.pallas_call(
      kernel,
      out_shape=jax.ShapeDtypeStruct((B, T, D), jnp.float32),
      grid=(B,),
      in_specs=[xspec] + [_const(w) for w in weights],
      out_specs=xspec,
      compiler_params=pltpu.CompilerParams(
          dimension_semantics=("parallel",),
          vmem_limit_bytes=32 * 1024 * 1024),
  )(x_bf, *weights)


# ---------------------------------------------------------------------------
# Pure-JAX f32 reference (matches torch Attn.forward semantics, factored
# low-rank weights, exact softmax).
# ---------------------------------------------------------------------------
def attn_reference(x, params, *, d_k, d_v, n_heads):
  B, T, D = x.shape

  def lowrank(z, w1, w2, b=None):
    o = z @ w1 @ w2
    return o if b is None else o + b

  q = lowrank(x, params["qw1"], params["qw2"], params["qb"])
  k = lowrank(x, params["kw1"], params["kw2"], params["kb"])
  v = lowrank(x, params["vw1"], params["vw2"], params["vb"])
  sh = lambda t, dh: t.reshape(B, T, n_heads, dh).transpose(0, 2, 1, 3)
  q, k, v = sh(q, d_k), sh(k, d_k), sh(v, d_v)
  s = jnp.einsum('bhtd,bhsd->bhts', q / math.sqrt(d_k), k)
  mask = jnp.tril(jnp.ones((T, T), jnp.float32))
  s = jnp.where(mask > 0, s, -jnp.inf)
  p = jax.nn.softmax(s, axis=-1)
  o = jnp.einsum('bhts,bhsd->bhtd', p, v)
  o = o.transpose(0, 2, 1, 3).reshape(B, T, n_heads * d_v)
  return lowrank(o, params["ow1"], params["ow2"])


def init_params(key, *, d_model, d_k, d_v, n_heads, d_rank):
  ks = jax.random.split(key, 11)
  w = lambda k, shape: 0.02 * jax.random.normal(k, shape, dtype=jnp.float32)
  Hk, Hv = n_heads * d_k, n_heads * d_v
  return {
      "qw1": w(ks[0], (d_model, d_rank)), "qw2": w(ks[1], (d_rank, Hk)),
      "qb": w(ks[2], (1, Hk)),
      "kw1": w(ks[3], (d_model, d_rank)), "kw2": w(ks[4], (d_rank, Hk)),
      "kb": w(ks[5], (1, Hk)),
      "vw1": w(ks[6], (d_model, d_rank)), "vw2": w(ks[7], (d_rank, Hv)),
      "vb": w(ks[8], (1, Hv)),
      "ow1": w(ks[9], (Hv, d_rank)), "ow2": w(ks[10], (d_rank, d_model)),
  }


if __name__ == "__main__":
  # Small, lane-friendly config: d_model = n_heads*d_k = n_heads*d_v = 128,
  # T = 64 (multiple of 8), B = 4 -> 4 parallel grid steps.
  d_model, d_k, d_v, n_heads, d_rank = 128, 32, 32, 4, 32
  B, T = 4, 64

  key = jax.random.PRNGKey(0)
  pkey, xkey = jax.random.split(key)
  params = init_params(pkey, d_model=d_model, d_k=d_k, d_v=d_v,
                       n_heads=n_heads, d_rank=d_rank)
  x = jax.random.normal(xkey, (B, T, d_model), dtype=jnp.float32)

  prepped = prepare_params(params, d_k=d_k)             # once, outside hot path
  fwd = jax.jit(functools.partial(attn_forward, d_k=d_k, d_v=d_v,
                                  n_heads=n_heads))
  out = jax.block_until_ready(fwd(x, prepped))

  assert out.shape == (B, T, d_model), out.shape
  out_np = np.asarray(out)
  assert np.all(np.isfinite(out_np))

  ref = np.asarray(jax.block_until_ready(
      attn_reference(x, params, d_k=d_k, d_v=d_v, n_heads=n_heads)))
  # Tolerance accounts for bf16 matmul operands + EUP approx reciprocal.
  assert np.allclose(out_np, ref, rtol=0.1, atol=2e-4), \
      float(np.max(np.abs(out_np - ref)))

  print("KERNEL_OK")
</pallas_src>

<mosaic_0001>
module attributes {stable_mosaic.version = 11 : i64} {
  func.func @_fused_attn_kernel(%arg0: i32, %arg1: memref<1x64x128xbf16, #tpu.memory_space<vmem>>, %arg2: memref<128x128xbf16, #tpu.memory_space<vmem>>, %arg3: memref<1x128xf32, #tpu.memory_space<vmem>>, %arg4: memref<128x128xbf16, #tpu.memory_space<vmem>>, %arg5: memref<1x128xf32, #tpu.memory_space<vmem>>, %arg6: memref<128x128xbf16, #tpu.memory_space<vmem>>, %arg7: memref<1x128xf32, #tpu.memory_space<vmem>>, %arg8: memref<128x128xbf16, #tpu.memory_space<vmem>>, %arg9: memref<1x64x128xf32, #tpu.memory_space<vmem>>) attributes {dimension_semantics = [#tpu.dimension_semantics<parallel>], iteration_bounds = array<i64: 4>, scalar_prefetch = 0 : i64, scratch_operands = 0 : i64, tpu.core_type = #tpu.core_type<tc>, window_params = [{transform_indices = @transform_0, window_bounds = array<i64: 1, 64, 128>}, {pipeline_mode = #tpu.pipeline_mode<synchronous>, transform_indices = @transform_1, window_bounds = array<i64: 128, 128>}, {pipeline_mode = #tpu.pipeline_mode<synchronous>, transform_indices = @transform_2, window_bounds = array<i64: 1, 128>}, {pipeline_mode = #tpu.pipeline_mode<synchronous>, transform_indices = @transform_3, window_bounds = array<i64: 128, 128>}, {pipeline_mode = #tpu.pipeline_mode<synchronous>, transform_indices = @transform_4, window_bounds = array<i64: 1, 128>}, {pipeline_mode = #tpu.pipeline_mode<synchronous>, transform_indices = @transform_5, window_bounds = array<i64: 128, 128>}, {pipeline_mode = #tpu.pipeline_mode<synchronous>, transform_indices = @transform_6, window_bounds = array<i64: 1, 128>}, {pipeline_mode = #tpu.pipeline_mode<synchronous>, transform_indices = @transform_7, window_bounds = array<i64: 128, 128>}, {transform_indices = @transform_8, window_bounds = array<i64: 1, 64, 128>}]} {
    %c0 = arith.constant 0 : index
    %c0_0 = arith.constant 0 : index
    %c0_1 = arith.constant 0 : index
    %0 = vector.load %arg1[%c0, %c0_0, %c0_1] : memref<1x64x128xbf16, #tpu.memory_space<vmem>>, vector<1x64x128xbf16>
    %1 = vector.shape_cast %0 : vector<1x64x128xbf16> to vector<64x128xbf16>
    %c0_2 = arith.constant 0 : index
    %c0_3 = arith.constant 0 : index
    %2 = vector.load %arg2[%c0_2, %c0_3] : memref<128x128xbf16, #tpu.memory_space<vmem>>, vector<128x128xbf16>
    %cst = arith.constant dense<0.000000e+00> : vector<64x128xf32>
    %3 = tpu.matmul %1, %2, %cst {dimension_numbers = #tpu.dot_dimension_numbers<[1], [0], [0], [1], [0, 0, 1, 1], [], []>} : vector<64x128xbf16>, vector<128x128xbf16>, vector<64x128xf32> -> vector<64x128xf32>
    %c0_4 = arith.constant 0 : index
    %c0_5 = arith.constant 0 : index
    %4 = vector.load %arg3[%c0_4, %c0_5] : memref<1x128xf32, #tpu.memory_space<vmem>>, vector<1x128xf32>
    %5 = vector.broadcast %4 : vector<1x128xf32> to vector<64x128xf32>
    %6 = arith.addf %3, %5 : vector<64x128xf32>
    %7 = arith.truncf %6 : vector<64x128xf32> to vector<64x128xbf16>
    %c0_6 = arith.constant 0 : index
    %c0_7 = arith.constant 0 : index
    %8 = vector.load %arg4[%c0_6, %c0_7] : memref<128x128xbf16, #tpu.memory_space<vmem>>, vector<128x128xbf16>
    %cst_8 = arith.constant dense<0.000000e+00> : vector<64x128xf32>
    %9 = tpu.matmul %1, %8, %cst_8 {dimension_numbers = #tpu.dot_dimension_numbers<[1], [0], [0], [1], [0, 0, 1, 1], [], []>} : vector<64x128xbf16>, vector<128x128xbf16>, vector<64x128xf32> -> vector<64x128xf32>
    %c0_9 = arith.constant 0 : index
    %c0_10 = arith.constant 0 : index
    %10 = vector.load %arg5[%c0_9, %c0_10] : memref<1x128xf32, #tpu.memory_space<vmem>>, vector<1x128xf32>
    %11 = vector.broadcast %10 : vector<1x128xf32> to vector<64x128xf32>
    %12 = arith.addf %9, %11 : vector<64x128xf32>
    %13 = arith.truncf %12 : vector<64x128xf32> to vector<64x128xbf16>
    %c0_11 = arith.constant 0 : index
    %c0_12 = arith.constant 0 : index
    %14 = vector.load %arg6[%c0_11, %c0_12] : memref<128x128xbf16, #tpu.memory_space<vmem>>, vector<128x128xbf16>
    %cst_13 = arith.constant dense<0.000000e+00> : vector<64x128xf32>
    %15 = tpu.matmul %1, %14, %cst_13 {dimension_numbers = #tpu.dot_dimension_numbers<[1], [0], [0], [1], [0, 0, 1, 1], [], []>} : vector<64x128xbf16>, vector<128x128xbf16>, vector<64x128xf32> -> vector<64x128xf32>
    %c0_14 = arith.constant 0 : index
    %c0_15 = arith.constant 0 : index
    %16 = vector.load %arg7[%c0_14, %c0_15] : memref<1x128xf32, #tpu.memory_space<vmem>>, vector<1x128xf32>
    %17 = vector.broadcast %16 : vector<1x128xf32> to vector<64x128xf32>
    %18 = arith.addf %15, %17 : vector<64x128xf32>
    %19 = arith.truncf %18 : vector<64x128xf32> to vector<64x128xbf16>
    %20 = tpu.iota {dimensions = array<i32: 0>} : vector<64x64xi32>
    %21 = tpu.iota {dimensions = array<i32: 1>} : vector<64x64xi32>
    %22 = arith.cmpi sle, %21, %20 : vector<64x64xi32>
    %cst_16 = arith.constant 0.000000e+00 : f32
    %cst_17 = arith.constant -1.000000e+30 : f32
    %23 = vector.broadcast %cst_16 : f32 to vector<64x64xf32>
    %24 = vector.broadcast %cst_17 : f32 to vector<64x64xf32>
    %25 = arith.select %22, %23, %24 : vector<64x64xi1>, vector<64x64xf32>
    %26 = vector.extract_strided_slice %7 {offsets = [0, 0], sizes = [64, 32], strides = [1, 1]} : vector<64x128xbf16> to vector<64x32xbf16>
    %27 = vector.extract_strided_slice %13 {offsets = [0, 0], sizes = [64, 32], strides = [1, 1]} : vector<64x128xbf16> to vector<64x32xbf16>
    %28 = vector.extract_strided_slice %19 {offsets = [0, 0], sizes = [64, 32], strides = [1, 1]} : vector<64x128xbf16> to vector<64x32xbf16>
    %29 = tpu.transpose %27, [1, 0] : vector<64x32xbf16> -> vector<32x64xbf16>
    %cst_18 = arith.constant dense<0.000000e+00> : vector<64x64xf32>
    %30 = tpu.matmul %26, %29, %cst_18 {dimension_numbers = #tpu.dot_dimension_numbers<[1], [0], [0], [1], [0, 0, 1, 1], [], []>} : vector<64x32xbf16>, vector<32x64xbf16>, vector<64x64xf32> -> vector<64x64xf32>
    %31 = arith.addf %30, %25 : vector<64x64xf32>
    %cst_19 = arith.constant dense<0xFF800000> : vector<64xf32>
    %32 = vector.multi_reduction <maximumf>, %31, %cst_19 [1] : vector<64x64xf32> to vector<64xf32>
    %33 = vector.shape_cast %32 : vector<64xf32> to vector<64x1xf32>
    %34 = vector.broadcast %33 : vector<64x1xf32> to vector<64x64xf32>
    %35 = arith.subf %31, %34 : vector<64x64xf32>
    %36 = math.exp %35 : vector<64x64xf32>
    %cst_20 = arith.constant dense<0.000000e+00> : vector<64xf32>
    %37 = vector.multi_reduction <add>, %36, %cst_20 [1] : vector<64x64xf32> to vector<64xf32>
    %38 = vector.shape_cast %37 : vector<64xf32> to vector<64x1xf32>
    %39 = arith.truncf %36 : vector<64x64xf32> to vector<64x64xbf16>
    %cst_21 = arith.constant dense<0.000000e+00> : vector<64x32xf32>
    %40 = tpu.matmul %39, %28, %cst_21 {dimension_numbers = #tpu.dot_dimension_numbers<[1], [0], [0], [1], [0, 0, 1, 1], [], []>} : vector<64x64xbf16>, vector<64x32xbf16>, vector<64x32xf32> -> vector<64x32xf32>
    %41 = tpu.reciprocal %38 {approx = true} : vector<64x1xf32> -> vector<64x1xf32>
    %42 = vector.broadcast %41 : vector<64x1xf32> to vector<64x32xf32>
    %43 = arith.mulf %40, %42 : vector<64x32xf32>
    %44 = arith.truncf %43 : vector<64x32xf32> to vector<64x32xbf16>
    %45 = vector.extract_strided_slice %7 {offsets = [0, 32], sizes = [64, 32], strides = [1, 1]} : vector<64x128xbf16> to vector<64x32xbf16>
    %46 = vector.extract_strided_slice %13 {offsets = [0, 32], sizes = [64, 32], strides = [1, 1]} : vector<64x128xbf16> to vector<64x32xbf16>
    %47 = vector.extract_strided_slice %19 {offsets = [0, 32], sizes = [64, 32], strides = [1, 1]} : vector<64x128xbf16> to vector<64x32xbf16>
    %48 = tpu.transpose %46, [1, 0] : vector<64x32xbf16> -> vector<32x64xbf16>
    %cst_22 = arith.constant dense<0.000000e+00> : vector<64x64xf32>
    %49 = tpu.matmul %45, %48, %cst_22 {dimension_numbers = #tpu.dot_dimension_numbers<[1], [0], [0], [1], [0, 0, 1, 1], [], []>} : vector<64x32xbf16>, vector<32x64xbf16>, vector<64x64xf32> -> vector<64x64xf32>
    %50 = arith.addf %49, %25 : vector<64x64xf32>
    %cst_23 = arith.constant dense<0xFF800000> : vector<64xf32>
    %51 = vector.multi_reduction <maximumf>, %50, %cst_23 [1] : vector<64x64xf32> to vector<64xf32>
    %52 = vector.shape_cast %51 : vector<64xf32> to vector<64x1xf32>
    %53 = vector.broadcast %52 : vector<64x1xf32> to vector<64x64xf32>
    %54 = arith.subf %50, %53 : vector<64x64xf32>
    %55 = math.exp %54 : vector<64x64xf32>
    %cst_24 = arith.constant dense<0.000000e+00> : vector<64xf32>
    %56 = vector.multi_reduction <add>, %55, %cst_24 [1] : vector<64x64xf32> to vector<64xf32>
    %57 = vector.shape_cast %56 : vector<64xf32> to vector<64x1xf32>
    %58 = arith.truncf %55 : vector<64x64xf32> to vector<64x64xbf16>
    %cst_25 = arith.constant dense<0.000000e+00> : vector<64x32xf32>
    %59 = tpu.matmul %58, %47, %cst_25 {dimension_numbers = #tpu.dot_dimension_numbers<[1], [0], [0], [1], [0, 0, 1, 1], [], []>} : vector<64x64xbf16>, vector<64x32xbf16>, vector<64x32xf32> -> vector<64x32xf32>
    %60 = tpu.reciprocal %57 {approx = true} : vector<64x1xf32> -> vector<64x1xf32>
    %61 = vector.broadcast %60 : vector<64x1xf32> to vector<64x32xf32>
    %62 = arith.mulf %59, %61 : vector<64x32xf32>
    %63 = arith.truncf %62 : vector<64x32xf32> to vector<64x32xbf16>
    %64 = vector.extract_strided_slice %7 {offsets = [0, 64], sizes = [64, 32], strides = [1, 1]} : vector<64x128xbf16> to vector<64x32xbf16>
    %65 = vector.extract_strided_slice %13 {offsets = [0, 64], sizes = [64, 32], strides = [1, 1]} : vector<64x128xbf16> to vector<64x32xbf16>
    %66 = vector.extract_strided_slice %19 {offsets = [0, 64], sizes = [64, 32], strides = [1, 1]} : vector<64x128xbf16> to vector<64x32xbf16>
    %67 = tpu.transpose %65, [1, 0] : vector<64x32xbf16> -> vector<32x64xbf16>
    %cst_26 = arith.constant dense<0.000000e+00> : vector<64x64xf32>
    %68 = tpu.matmul %64, %67, %cst_26 {dimension_numbers = #tpu.dot_dimension_numbers<[1], [0], [0], [1], [0, 0, 1, 1], [], []>} : vector<64x32xbf16>, vector<32x64xbf16>, vector<64x64xf32> -> vector<64x64xf32>
    %69 = arith.addf %68, %25 : vector<64x64xf32>
    %cst_27 = arith.constant dense<0xFF800000> : vector<64xf32>
    %70 = vector.multi_reduction <maximumf>, %69, %cst_27 [1] : vector<64x64xf32> to vector<64xf32>
    %71 = vector.shape_cast %70 : vector<64xf32> to vector<64x1xf32>
    %72 = vector.broadcast %71 : vector<64x1xf32> to vector<64x64xf32>
    %73 = arith.subf %69, %72 : vector<64x64xf32>
    %74 = math.exp %73 : vector<64x64xf32>
    %cst_28 = arith.constant dense<0.000000e+00> : vector<64xf32>
    %75 = vector.multi_reduction <add>, %74, %cst_28 [1] : vector<64x64xf32> to vector<64xf32>
    %76 = vector.shape_cast %75 : vector<64xf32> to vector<64x1xf32>
    %77 = arith.truncf %74 : vector<64x64xf32> to vector<64x64xbf16>
    %cst_29 = arith.constant dense<0.000000e+00> : vector<64x32xf32>
    %78 = tpu.matmul %77, %66, %cst_29 {dimension_numbers = #tpu.dot_dimension_numbers<[1], [0], [0], [1], [0, 0, 1, 1], [], []>} : vector<64x64xbf16>, vector<64x32xbf16>, vector<64x32xf32> -> vector<64x32xf32>
    %79 = tpu.reciprocal %76 {approx = true} : vector<64x1xf32> -> vector<64x1xf32>
    %80 = vector.broadcast %79 : vector<64x1xf32> to vector<64x32xf32>
    %81 = arith.mulf %78, %80 : vector<64x32xf32>
    %82 = arith.truncf %81 : vector<64x32xf32> to vector<64x32xbf16>
    %83 = vector.extract_strided_slice %7 {offsets = [0, 96], sizes = [64, 32], strides = [1, 1]} : vector<64x128xbf16> to vector<64x32xbf16>
    %84 = vector.extract_strided_slice %13 {offsets = [0, 96], sizes = [64, 32], strides = [1, 1]} : vector<64x128xbf16> to vector<64x32xbf16>
    %85 = vector.extract_strided_slice %19 {offsets = [0, 96], sizes = [64, 32], strides = [1, 1]} : vector<64x128xbf16> to vector<64x32xbf16>
    %86 = tpu.transpose %84, [1, 0] : vector<64x32xbf16> -> vector<32x64xbf16>
    %cst_30 = arith.constant dense<0.000000e+00> : vector<64x64xf32>
    %87 = tpu.matmul %83, %86, %cst_30 {dimension_numbers = #tpu.dot_dimension_numbers<[1], [0], [0], [1], [0, 0, 1, 1], [], []>} : vector<64x32xbf16>, vector<32x64xbf16>, vector<64x64xf32> -> vector<64x64xf32>
    %88 = arith.addf %87, %25 : vector<64x64xf32>
    %cst_31 = arith.constant dense<0xFF800000> : vector<64xf32>
    %89 = vector.multi_reduction <maximumf>, %88, %cst_31 [1] : vector<64x64xf32> to vector<64xf32>
    %90 = vector.shape_cast %89 : vector<64xf32> to vector<64x1xf32>
    %91 = vector.broadcast %90 : vector<64x1xf32> to vector<64x64xf32>
    %92 = arith.subf %88, %91 : vector<64x64xf32>
    %93 = math.exp %92 : vector<64x64xf32>
    %cst_32 = arith.constant dense<0.000000e+00> : vector<64xf32>
    %94 = vector.multi_reduction <add>, %93, %cst_32 [1] : vector<64x64xf32> to vector<64xf32>
    %95 = vector.shape_cast %94 : vector<64xf32> to vector<64x1xf32>
    %96 = arith.truncf %93 : vector<64x64xf32> to vector<64x64xbf16>
    %cst_33 = arith.constant dense<0.000000e+00> : vector<64x32xf32>
    %97 = tpu.matmul %96, %85, %cst_33 {dimension_numbers = #tpu.dot_dimension_numbers<[1], [0], [0], [1], [0, 0, 1, 1], [], []>} : vector<64x64xbf16>, vector<64x32xbf16>, vector<64x32xf32> -> vector<64x32xf32>
    %98 = tpu.reciprocal %95 {approx = true} : vector<64x1xf32> -> vector<64x1xf32>
    %99 = vector.broadcast %98 : vector<64x1xf32> to vector<64x32xf32>
    %100 = arith.mulf %97, %99 : vector<64x32xf32>
    %101 = arith.truncf %100 : vector<64x32xf32> to vector<64x32xbf16>
    %102 = tpu.concatenate %44, %63, %82, %101 in 1 : vector<64x32xbf16>, vector<64x32xbf16>, vector<64x32xbf16>, vector<64x32xbf16> -> vector<64x128xbf16>
    %c0_34 = arith.constant 0 : index
    %c0_35 = arith.constant 0 : index
    %103 = vector.load %arg8[%c0_34, %c0_35] : memref<128x128xbf16, #tpu.memory_space<vmem>>, vector<128x128xbf16>
    %cst_36 = arith.constant dense<0.000000e+00> : vector<64x128xf32>
    %104 = tpu.matmul %102, %103, %cst_36 {dimension_numbers = #tpu.dot_dimension_numbers<[1], [0], [0], [1], [0, 0, 1, 1], [], []>} : vector<64x128xbf16>, vector<128x128xbf16>, vector<64x128xf32> -> vector<64x128xf32>
    %c0_37 = arith.constant 0 : index
    %c0_38 = arith.constant 0 : index
    %c0_39 = arith.constant 0 : index
    %105 = vector.load %arg9[%c0_37, %c0_38, %c0_39] : memref<1x64x128xf32, #tpu.memory_space<vmem>>, vector<1x64x128xf32>
    %106 = vector.shape_cast %105 : vector<1x64x128xf32> to vector<64x128xf32>
    %107 = vector.shape_cast %104 : vector<64x128xf32> to vector<1x64x128xf32>
    tpu.vector_store %arg9[%c0_37, %c0_38, %c0_39], %107 {strides = array<i32>} : memref<1x64x128xf32, #tpu.memory_space<vmem>>, vector<1x64x128xf32>,
    return
  }
  func.func @transform_0(%arg0: i32) -> (i32, i32, i32) {
    %c0_i32 = arith.constant 0 : i32
    %c0_i32_0 = arith.constant 0 : i32
    %c0_i32_1 = arith.constant 0 : i32
    return %arg0, %c0_i32, %c0_i32_0 : i32, i32, i32
  }
  func.func @transform_1(%arg0: i32) -> (i32, i32) {
    %c0_i32 = arith.constant 0 : i32
    %c0_i32_0 = arith.constant 0 : i32
    %c0_i32_1 = arith.constant 0 : i32
    return %c0_i32, %c0_i32_0 : i32, i32
  }
  func.func @transform_2(%arg0: i32) -> (i32, i32) {
    %c0_i32 = arith.constant 0 : i32
    %c0_i32_0 = arith.constant 0 : i32
    %c0_i32_1 = arith.constant 0 : i32
    return %c0_i32, %c0_i32_0 : i32, i32
  }
  func.func @transform_3(%arg0: i32) -> (i32, i32) {
    %c0_i32 = arith.constant 0 : i32
    %c0_i32_0 = arith.constant 0 : i32
    %c0_i32_1 = arith.constant 0 : i32
    return %c0_i32, %c0_i32_0 : i32, i32
  }
  func.func @transform_4(%arg0: i32) -> (i32, i32) {
    %c0_i32 = arith.constant 0 : i32
    %c0_i32_0 = arith.constant 0 : i32
    %c0_i32_1 = arith.constant 0 : i32
    return %c0_i32, %c0_i32_0 : i32, i32
  }
  func.func @transform_5(%arg0: i32) -> (i32, i32) {
    %c0_i32 = arith.constant 0 : i32
    %c0_i32_0 = arith.constant 0 : i32
    %c0_i32_1 = arith.constant 0 : i32
    return %c0_i32, %c0_i32_0 : i32, i32
  }
  func.func @transform_6(%arg0: i32) -> (i32, i32) {
    %c0_i32 = arith.constant 0 : i32
    %c0_i32_0 = arith.constant 0 : i32
    %c0_i32_1 = arith.constant 0 : i32
    return %c0_i32, %c0_i32_0 : i32, i32
  }
  func.func @transform_7(%arg0: i32) -> (i32, i32) {
    %c0_i32 = arith.constant 0 : i32
    %c0_i32_0 = arith.constant 0 : i32
    %c0_i32_1 = arith.constant 0 : i32
    return %c0_i32, %c0_i32_0 : i32, i32
  }
  func.func @transform_8(%arg0: i32) -> (i32, i32, i32) {
    %c0_i32 = arith.constant 0 : i32
    %c0_i32_0 = arith.constant 0 : i32
    %c0_i32_1 = arith.constant 0 : i32
    return %arg0, %c0_i32, %c0_i32_0 : i32, i32, i32
  }
}

</mosaic_0001>

<bundles_post_ra>
// kernel: attn_forward.1
= control target key start
LH: loop header
LB: loop body
LE: loop exit
PB: predicated region body
PF: predicated region fallthrough
CT: control target
= control target key end

     0   :  { %13 = vsyncpa [#allocation3], 0  ;;  %s3197_s0 = inlined_call_operand.vmem [shape: bf16[4,64,128], index: 0, kind: input, shape index: {}]   ;;  %s3198_s1 = inlined_call_operand.vmem [shape: bf16[128,128], index: 1, kind: input, shape index: {}]   ;;  %s3199_s2 = inlined_call_operand.vmem [shape: f32[1,128], index: 2, kind: input, shape index: {}]   ;;  %s3200_s3 = inlined_call_operand.vmem [shape: bf16[128,128], index: 3, kind: input, shape index: {}]   ;;  %s3201_s4 = inlined_call_operand.vmem [shape: f32[1,128], index: 4, kind: input, shape index: {}]   ;;  %s3202_s5 = inlined_call_operand.vmem [shape: bf16[128,128], index: 5, kind: input, shape index: {}]   ;;  %s3203_s6 = inlined_call_operand.vmem [shape: f32[1,128], index: 6, kind: input, shape index: {}]   ;;  %s3204_s7 = inlined_call_operand.vmem [shape: bf16[128,128], index: 7, kind: input, shape index: {}]   ;;  %s3205_s8 = inlined_call_operand.hbm [shape: f32[4,64,128], index: 8, kind: output, shape index: {}]  }
   0x1   :  { %15 = vsyncpa [#allocation3 + $0x1], 0  ;;  %s2438_s27 = smov 0   ;;  %s2440_s28 = smov 0  }
   0x2   :  { %s2442_s29 = smov 0   ;;  %s2444_s30 = smov 0  }
   0x3 LB: > { %s2459_s9 = sadd.s32 4294967295, %s2385_s30   ;;  %s1921_s10 = sadd.s32 4294967294, %s2385_s30   ;;  %s2385_s30 = sphi %s2444_s30, %s3211_s30   ;;  %s2381_s29 = sphi %s2442_s29, %s3210_s29   ;;  %s2377_s28 = sphi %s2440_s28, %s3209_s28   ;;  %s2373_s27 = sphi %s2438_s27, %s3208_s27  }
   0x4   : > { %s2463_s11 = sadd.s32 1, %s2385_s30   ;;  %s201_s12 = sadd.s32 1, %s2381_s29 }
   0x5   : > { %s198_s13 = ssub.s32 %s2385_s30, %s2463_s11  ;;  %p211_p0 = scmp.ne.s32.totalorder %s2381_s29, %s2377_s28 }
   0x6   : > { %p199_p1 = scmp.eq.s32.totalorder %s198_s13, 0  ;;  %p212_p2 = scmp.eq.s32.totalorder %s2459_s9, 3 }
   0x7   : > { %p217_p3 = scmp.ne.s32.totalorder %s2377_s28, %s2373_s27  ;;  %p218_p4 = scmp.eq.s32.totalorder %s1921_s10, 3 }
   0x8   : > { %s2474_s14 = scalar_select %p199_p1, %s2381_s29, %s201_s12  }
   0x9   : > { %p2476_p5 = por %p212_p2, %p211_p0  ;;  %p2480_p6 = por %p218_p4, %p217_p3 }
   0xa   : > { %p1924_p7 = scmp.ge.s32.totalorder %s2385_s30, 1  ;;  %p265_p8 = scmp.lt.s32.totalorder %s2385_s30, 5 }
   0xc   : > { %p266_p9 = pnand %p1924_p7, %p265_p8 }
   0xd   : > { %p299_p10 = scmp.lt.s32.totalorder (!%p266_p9), %s2459_s9, 3  ;;  %s2388_s23 = smov (!%p266_p9), 64  }
   0xe   : > { %269 = sbr.rel (%p266_p9) target bundleno = 1305 (0x519), region = 52  ;;  %s2389_s24 = smov (!%p266_p9), 32  }
   0xf   : > { %s2146_s21 = sshll.u32 (!%p266_p9), %s2459_s9, 6 }
  0x10   : > { %s1855_s26 = scalar_lea.hbm (!%p266_p9), %s3205_s8, %s2146_s21 }
  0x11   : > { %s1858_s13 = sshll.u32 (!%p266_p9), %s1855_s26, 4  ;;  %s1859_s13 = int_to_ptr.hbm [resolvable:$true] %s1858_s13 }
  0x12   : > { %s2337_s18 = sshra.s32 (!%p266_p9), %s1859_s13, 4  ;;  %s2338_s18 = int_to_ptr.hbm [resolvable:$true] %s2337_s18 }
  0x13   : > { %v2121_v0 = vld [vmem:[%s3198_s1 + $0x38] sm:$0xff]  ;;  %v2120_v2 = vld [vmem:[%s3198_s1 + $0x30] sm:$0xff]  ;;  %v2119_v4 = vld [vmem:[%s3198_s1 + $0x28] sm:$0xff]  ;;  %s300_s12 = scalar_select %p299_p10, %s2459_s9, 3  ;;  %vm719_vm0 = vcmask 261120   ;;  %vm773_vm2 = vcmask 523264  }
  0x14   : > { %v2129_v1 = vld [vmem:[%s3200_s3 + $0x38] sm:$0xff]  ;;  %405 = vmatpush.bf16.msra.mxu0 %v2121_v0  ;;  %v2128_v3 = vld [vmem:[%s3200_s3 + $0x30] sm:$0xff]  ;;  %v2127_v5 = vld [vmem:[%s3200_s3 + $0x28] sm:$0xff]  ;;  %vm1729_vm10 = vcmask 785408   ;;  %s2339_s19 = scalar_lea.hbm %s2338_s18, 64  ;;  %p2344_p0 = scmp.lt.s32.totalorder %s2338_s18, %s3205_s8 }
  0x15   : > { %510 = vmatpush.bf16.msra.mxu1 %v2129_v1  ;;  %v2118_v6 = vld [vmem:[%s3198_s1 + $0x20] sm:$0xff]  ;;  %v2117_v8 = vld [vmem:[%s3198_s1 + $0x18] sm:$0xff]  ;;  %v2116_v10 = vld [vmem:[%s3198_s1 + $0x10] sm:$0xff]  ;;  %s2109_s20 = sshll.u32 %s300_s12, 5  ;;  %p2340_p11 = scmp.ne.s32.totalorder %s2338_s18, %s2339_s19 }
  0x16   : > { %v2126_v7 = vld [vmem:[%s3200_s3 + $0x20] sm:$0xff]  ;;  %v2125_v9 = vld [vmem:[%s3200_s3 + $0x18] sm:$0xff]  ;;  %v2124_v11 = vld [vmem:[%s3200_s3 + $0x10] sm:$0xff]  ;;  %s303_s10 = scalar_lea.vmem %s3197_s0, %s2109_s20 }
  0x17   : > { %v2115_v12 = vld [vmem:[%s3198_s1 + $0x8] sm:$0xff]  ;;  %v2114_v14 = vld [vmem:[%s3198_s1] sm:$0xff]  ;;  %v2137_v18 = vld [vmem:[%s3202_s5 + $0x38] sm:$0xff]  ;;  %p2341_p12 = pnand %p2340_p11, %p2476_p5 }
  0x18   : > { %406 = vmatpush.bf16.msra.mxu0 %v2120_v2  ;;  %v2123_v13 = vld [vmem:[%s3200_s3 + $0x8] sm:$0xff]  ;;  %v2122_v15 = vld [vmem:[%s3200_s3] sm:$0xff]  ;;  %615 = vmatpush.bf16.msra.mxu2 %v2137_v18  ;;  %v2136_v19 = vld [vmem:[%s3202_s5 + $0x30] sm:$0xff] }
  0x19   : > { %511 = vmatpush.bf16.msra.mxu1 %v2128_v3  ;;  %v2110_v16 = vld [vmem:[%s303_s10] sm:$0xff]  ;;  %v2111_v17 = vld [vmem:[%s303_s10 + $0x8] sm:$0xff]  ;;  %v2112_v22 = vld [vmem:[%s303_s10 + $0x10] sm:$0xff]  ;;  %p2342_p13 = pneg %p2341_p12 }
  0x1a   : > { %v2135_v20 = vld [vmem:[%s3202_s5 + $0x28] sm:$0xff]  ;;  %v2134_v21 = vld [vmem:[%s3202_s5 + $0x20] sm:$0xff]  ;;  %v2133_v23 = vld [vmem:[%s3202_s5 + $0x18] sm:$0xff] }
  0x1b   : > { %v2132_v24 = vld [vmem:[%s3202_s5 + $0x10] sm:$0xff]  ;;  %v2131_v25 = vld [vmem:[%s3202_s5 + $0x8] sm:$0xff]  ;;  %v2130_v26 = vld [vmem:[%s3202_s5] sm:$0xff] }
  0x1c   : > { %407 = vmatpush.bf16.msra.mxu0 %v2119_v4  ;;  %616 = vmatpush.bf16.msra.mxu2 %v2136_v19  ;;  %v2113_v27 = vld [vmem:[%s303_s10 + $0x18] sm:$0xff]  ;;  %v2566_v28 = vld [vmem:[%s3199_s2] ss:$0 sm:$0xff]  ;;  %s2387_s10 = smov 96  }
  0x1d   : > { %512 = vmatpush.bf16.msra.mxu1 %v2127_v5  ;;  %v2193_v42 = vld [vmem:[%s3201_s4] ss:$0 sm:$0xff] }
  0x20   : > { %408 = vmatpush.bf16.msra.mxu0 %v2118_v6  ;;  %617 = vmatpush.bf16.msra.mxu2 %v2135_v20 }
  0x21   : > { %513 = vmatpush.bf16.msra.mxu1 %v2126_v7 }
  0x24   : > { %409 = vmatpush.bf16.msra.mxu0 %v2117_v8  ;;  %618 = vmatpush.bf16.msra.mxu2 %v2134_v21 }
  0x25   : > { %514 = vmatpush.bf16.msra.mxu1 %v2125_v9 }
  0x28   : > { %410 = vmatpush.bf16.msra.mxu0 %v2116_v10  ;;  %619 = vmatpush.bf16.msra.mxu2 %v2133_v23 }
  0x29   : > { %515 = vmatpush.bf16.msra.mxu1 %v2124_v11 }
  0x2c   : > { %411 = vmatpush.bf16.msra.mxu0 %v2115_v12  ;;  %620 = vmatpush.bf16.msra.mxu2 %v2132_v24 }
  0x2d   : > { %516 = vmatpush.bf16.msra.mxu1 %v2123_v13 }
  0x30   : > { %412 = vmatpush.bf16.msra.mxu0 %v2114_v14  ;;  %621 = vmatpush.bf16.msra.mxu2 %v2131_v25 }
  0x31   : > { %517 = vmatpush.bf16.msra.mxu1 %v2122_v15 }
  0x33   : > { %413 = vmatmul.bf16.vlgmr.msra.gmra.mxu0 %v2110_v16 }
  0x34   : > { %518 = vmatmul.bf16.vlgmr.msra.gmra.mxu1 %v2110_v16  ;;  %622 = vmatpush.bf16.msra.mxu2 %v2130_v26 }
  0x37   : > { %623 = vmatmul.bf16.vlgmr.msra.gmra.mxu2 %v2110_v16 }
  0x43   : > { %418 = vmatmul.bf16.gmra.mxu0 %v2111_v17 }
  0x44   : > { %523 = vmatmul.bf16.gmra.mxu1 %v2111_v17 }
  0x47   : > { %628 = vmatmul.bf16.gmra.mxu2 %v2111_v17 }
  0x53   : > { %423 = vmatmul.bf16.gmra.mxu0 %v2112_v22 }
  0x54   : > { %528 = vmatmul.bf16.gmra.mxu1 %v2112_v22 }
  0x57   : > { %633 = vmatmul.bf16.gmra.mxu2 %v2112_v22 }
  0x63   : > { %428 = vmatmul.bf16.gmra.mxu0 %v2113_v27 }
  0x64   : > { %533 = vmatmul.bf16.gmra.mxu1 %v2113_v27 }
  0x67   : > { %638 = vmatmul.bf16.gmra.mxu2 %v2113_v27 }
  0xb0   : > { %v414_v29 = vpop.f32.mrf.mxu0 }
  0xb1   : > { %v519_v30 = vpop.f32.mrf.mxu1  ;;  %v415_v31 = vadd.f32 %v2566_v28, %v414_v29 }
  0xb2   : > { %v520_v55 = vadd.f32 %v2193_v42, %v519_v30 }
  0xb3   : > { %v434_v32 = vpack.c.bf16 %v415_v31, %v415_v31 }
  0xb4   : > { %v539_v0 = vpack.c.bf16 %v520_v55, %v520_v55 }
  0xb5   : > { %v687_v36 = vunpack.c.l.b16 %v434_v32 }
  0xb6   : > { %v707_v3 = vunpack.c.l.b16 %v539_v0 }
  0xb8   : > { %v416_v33 = vpop.f32.mrf.mxu0 }
  0xb9   : > { %v521_v34 = vpop.f32.mrf.mxu1  ;;  %v417_v35 = vadd.f32 %v2566_v28, %v416_v33 }
  0xba   : > { %v522_v51 = vadd.f32 %v2193_v42, %v521_v34  ;;  %v624_v31 = vpop.f32.mrf.mxu2 }
  0xbb   : > { %v435_v37 = vpack.c.bf16 %v417_v35, %v417_v35 }
  0xbc   : > { %v540_v59 = vpack.c.bf16 %v522_v51, %v522_v51 }
  0xbd   : > { %v688_v38 = vunpack.c.l.b16 %v435_v37  ;;  %v2194_v37 = vld [vmem:[%s3203_s6] ss:$0 sm:$0xff] }
  0xbe   : > { %v708_v1 = vunpack.c.l.b16 %v540_v59 }
  0xbf   : > { %v2570_v39 = vpack.c.b16 %v688_v38, %v687_v36 }
  0xc0   : > { %v419_v40 = vpop.f32.mrf.mxu0  ;;  %v715_v4 = vpack.c.b16 %v708_v1, %v707_v3 }
  0xc1   : > { %v524_v41 = vpop.f32.mrf.mxu1  ;;  %939 = vrot.lane.b32.xlu2 %v2570_v39, %s2387_s10  ;;  %v420_v43 = vadd.f32 %v2566_v28, %v419_v40 }
  0xc2   : > { %v525_v44 = vadd.f32 %v2193_v42, %v524_v41  ;;  %v626_v33 = vpop.f32.mrf.mxu2  ;;  %v733_v40 = vsel %vm719_vm0, %v715_v4, 0 }
  0xc3   : > { %v436_v45 = vpack.c.bf16 %v420_v43, %v420_v43  ;;  %v627_v43 = vadd.f32 %v2194_v37, %v626_v33 }
  0xc4   : > { %v541_v48 = vpack.c.bf16 %v525_v44, %v525_v44 }
  0xc5   : > { %v689_v52 = vunpack.c.l.b16 %v436_v45 }
  0xc6   : > { %v709_v56 = vunpack.c.l.b16 %v541_v48 }
  0xc8   : > { %v421_v46 = vpop.f32.mrf.mxu0 }
  0xc9   : > { %v526_v47 = vpop.f32.mrf.mxu1  ;;  %v422_v49 = vadd.f32 %v2566_v28, %v421_v46 }
  0xca   : > { %v527_v50 = vadd.f32 %v2193_v42, %v526_v47  ;;  %v629_v36 = vpop.f32.mrf.mxu2 }
  0xcb   : > { %v437_v53 = vpack.c.bf16 %v422_v49, %v422_v49  ;;  %v630_v44 = vadd.f32 %v2194_v37, %v629_v36  ;;  %v645_v49 = vpack.c.bf16 %v627_v43, %v627_v43 }
  0xcc   : > { %v542_v54 = vpack.c.bf16 %v527_v50, %v527_v50 }
  0xcd   : > { %v690_v57 = vunpack.c.l.b16 %v437_v53  ;;  %v646_v50 = vpack.c.bf16 %v630_v44, %v630_v44  ;;  %v859_v53 = vunpack.c.l.b16 %v645_v49 }
  0xce   : > { %v710_v58 = vunpack.c.l.b16 %v542_v54 }
  0xcf   : > { %v2579_v60 = vpack.c.b16 %v690_v57, %v689_v52  ;;  %v860_v54 = vunpack.c.l.b16 %v646_v50 }
  0xd0   : > { %v716_v61 = vpack.c.b16 %v710_v58, %v709_v56  ;;  %v424_v62 = vpop.f32.mrf.mxu0 }
  0xd1   : > { %v529_v63 = vpop.f32.mrf.mxu1  ;;  %941 = vrot.lane.b32.xlu2 %v2579_v60, %s2387_s10  ;;  %v425_v2 = vadd.f32 %v2566_v28, %v424_v62 }
  0xd2   : > { %949 = vrot.lane.b32.xlu1 %v716_v61, %s2387_s10  ;;  %v530_v12 = vadd.f32 %v2193_v42, %v529_v63  ;;  %v736_v35 = vsel %vm719_vm0, %v716_v61, 0  ;;  %v631_v41 = vpop.f32.mrf.mxu2 }
  0xd3   : > { %v438_v5 = vpack.c.bf16 %v425_v2, %v425_v2  ;;  %v632_v45 = vadd.f32 %v2194_v37, %v631_v41 }
  0xd4   : > { %v543_v17 = vpack.c.bf16 %v530_v12, %v530_v12 }
  0xd5   : > { %v691_v9 = vunpack.c.l.b16 %v438_v5  ;;  %v647_v51 = vpack.c.bf16 %v632_v45, %v632_v45 }
  0xd6   : > { %v711_v19 = vunpack.c.l.b16 %v543_v17 }
  0xd7   : > { %v861_v55 = vunpack.c.l.b16 %v647_v51 }
  0xd8   : > { %v426_v6 = vpop.f32.mrf.mxu0 }
  0xd9   : > { %v531_v7 = vpop.f32.mrf.mxu1  ;;  %v427_v8 = vadd.f32 %v2566_v28, %v426_v6  ;;  %1171 = vrot.lane.b32.xlu2 %v716_v61, %s2388_s23  ;;  %v2619_v59 = vpack.c.b16 %v861_v55, %v860_v54 }
  0xda   : > { %947 = vrot.lane.b32.xlu1 %v715_v4, %s2387_s10  ;;  %v532_v11 = vadd.f32 %v2193_v42, %v531_v7 }
  0xdb   : > { %v439_v10 = vpack.c.bf16 %v427_v8, %v427_v8 }
  0xdc   : > { %v544_v15 = vpack.c.bf16 %v532_v11, %v532_v11 }
  0xdd   : > { %v692_v13 = vunpack.c.l.b16 %v439_v10 }
  0xde   : > { %v712_v18 = vunpack.c.l.b16 %v544_v15 }
  0xdf   : > { %v2588_v14 = vpack.c.b16 %v692_v13, %v691_v9 }
  0xe0   : > { %v717_v21 = vpack.c.b16 %v712_v18, %v711_v19  ;;  %v429_v34 = vpop.f32.mrf.mxu0 }
  0xe1   : > { %v534_v16 = vpop.f32.mrf.mxu1  ;;  %1169 = vrot.lane.b32.xlu2 %v715_v4, %s2388_s23  ;;  %v430_v46 = vadd.f32 %v2566_v28, %v429_v34 }
  0xe2   : > { %943 = vrot.lane.b32.xlu1 %v2588_v14, %s2387_s10  ;;  %v535_v20 = vadd.f32 %v2193_v42, %v534_v16  ;;  %v739_v32 = vsel %vm719_vm0, %v717_v21, 0 }
  0xe3   : > { %v440_v56 = vpack.c.bf16 %v430_v46, %v430_v46  ;;  %v2390_v46 = vmov -1e+30  }
  0xe4   : > { %v545_v23 = vpack.c.bf16 %v535_v20, %v535_v20 }
  0xe6   : > { %v713_v26 = vunpack.c.l.b16 %v545_v23 }
  0xe8   : > { %v431_v38 = vpop.f32.mrf.mxu0 }
  0xe9   : > { %v536_v22 = vpop.f32.mrf.mxu1  ;;  %1383 = vrot.lane.b32.xlu2 %v2570_v39, %s2389_s24  ;;  %v432_v47 = vadd.f32 %v2566_v28, %v431_v38  ;;  %v693_v28 = vunpack.c.l.b16 %v440_v56 }
  0xea   : > { %v537_v24 = vadd.f32 %v2193_v42, %v536_v22  ;;  %1395 = vrot.lane.b32.xlu1 %v717_v21, %s2389_s24  ;;  %v625_v42 = vadd.f32 %v2194_v37, %v624_v31 }
  0xeb   : > { %v441_v57 = vpack.c.bf16 %v432_v47, %v432_v47 }
  0xec   : > { %v546_v25 = vpack.c.bf16 %v537_v24, %v537_v24  ;;  %v644_v48 = vpack.c.bf16 %v625_v42, %v625_v42 }
  0xee   : > { %v714_v27 = vunpack.c.l.b16 %v546_v25  ;;  %v858_v52 = vunpack.c.l.b16 %v644_v48 }
  0xf0   : > { %v718_v29 = vpack.c.b16 %v714_v27, %v713_v26  ;;  %v2617_v58 = vpack.c.b16 %v859_v53, %v858_v52 }
  0xf1   : > { %1165 = vrot.lane.b32.xlu2 %v2588_v14, %s2388_s23 }
  0xf2   : > { %953 = vrot.lane.b32.xlu0 %v718_v29, %s2387_s10  ;;  %1393 = vrot.lane.b32.xlu1 %v716_v61, %s2389_s24  ;;  %v742_v30 = vsel %vm719_vm0, %v718_v29, 0  ;;  %v694_v61 = vunpack.c.l.b16 %v441_v57 }
  0xf3   : > { %748 = vmatpush.bf16.xpose.msra.mxu3 %v742_v30 }
  0xf4   : > { %v698_v62 = vpack.c.b16 %v694_v61, %v693_v28 }
  0xf9   : > { %1397 = vrot.lane.b32.xlu2 %v718_v29, %s2389_s24 }
  0xfa   : > { %951 = vrot.lane.b32.xlu0 %v717_v21, %s2387_s10  ;;  %1161 = vrot.lane.b32.xlu1 %v2570_v39, %s2388_s23 }
  0xfb   : > { %749 = vmatpush.bf16.xpose.msra.mxu3 %v739_v32 }
 0x101   : > { %1084 = vrot.lane.b32.xlu2 %v2617_v58, %s2387_s10 }
 0x102   : > { %1173 = vrot.lane.b32.xlu0 %v717_v21, %s2388_s23  ;;  %1385 = vrot.lane.b32.xlu1 %v2579_v60, %s2389_s24 }
 0x103   : > { %750 = vmatpush.bf16.xpose.msra.mxu3 %v736_v35 }
 0x109   : > { %1389 = vrot.lane.b32.xlu2 %v698_v62, %s2389_s24 }
 0x10a   : > { %1391 = vrot.lane.b32.xlu0 %v715_v4, %s2389_s24  ;;  %1086 = vrot.lane.b32.xlu1 %v2619_v59, %s2387_s10 }
 0x10b   : > { %751 = vmatpush.bf16.xpose.msra.mxu3 %v733_v40  ;;  %v652_v40 = vlaneseq }
 0x10d   : > { %v2664_v42 = vshrl.u32 %v652_v40, 7  ;;  %v2666_v43 = vand.u32 127, %v652_v40 }
 0x10f   : > { %vm663_vm1 = vcmp.le.s32.totalorder %v2666_v43, %v2664_v42  ;;  %v654_v49 = vadd.s32 8, %v2664_v42  ;;  %v655_v56 = vadd.s32 16, %v2664_v42 }
 0x110   : > { %v2673_v47 = vsel %vm663_vm1, 0.0, %v2390_v46 }
 0x111   : > { %vm664_vm3 = vcmp.le.s32.totalorder %v2666_v43, %v654_v49  ;;  %vm665_vm4 = vcmp.le.s32.totalorder %v2666_v43, %v655_v56 }
 0x112   : > { %1175 = vrot.lane.b32.xlu0 %v718_v29, %s2388_s23  ;;  %2040 = vmatmul.msk.bf16.vlgmr.msra.gmra.mxu3 %vm719_vm0, %v2570_v39  ;;  %v634_v39 = vpop.f32.mrf.mxu2  ;;  %v2686_v55 = vsel %vm664_vm3, 0.0, %v2390_v46 }
 0x113   : > { %1167 = vrot.lane.b32.xlu1 %v698_v62, %s2388_s23  ;;  %v635_v0 = vadd.f32 %v2194_v37, %v634_v39 }
 0x115   : > { %v648_v1 = vpack.c.bf16 %v635_v0, %v635_v0 }
 0x117   : > { %v862_v4 = vunpack.c.l.b16 %v648_v1  ;;  %v656_v1 = vadd.s32 24, %v2664_v42 }
 0x119   : > { %vm666_vm5 = vcmp.le.s32.totalorder %v2666_v43, %v656_v1 }
 0x11a   : > { %1163 = vrot.lane.b32.xlu0 %v2579_v60, %s2388_s23  ;;  %v636_v63 = vpop.f32.mrf.mxu2 }
 0x11b   : > { %v637_v3 = vadd.f32 %v2194_v37, %v636_v63  ;;  %v940_v10 = vpop.permute.xlu2 %939  ;;  %v2697_v63 = vsel %vm665_vm4, 0.0, %v2390_v46 }
 0x11d   : > { %v649_v5 = vpack.c.bf16 %v637_v3, %v637_v3 }
 0x11f   : > { %v863_v6 = vunpack.c.l.b16 %v649_v5 }
 0x121   : > { %v2639_v7 = vpack.c.b16 %v863_v6, %v862_v4  ;;  %v2709_v6 = vsel %vm666_vm5, 0.0, %v2390_v46 }
 0x122   : > { %2041 = vmatmul.msk.bf16.gmra.mxu3 %vm719_vm0, %v2579_v60  ;;  %945 = vrot.lane.b32.xlu0 %v698_v62, %s2387_s10  ;;  %v639_v2 = vpop.f32.mrf.mxu2 }
 0x123   : > { %v640_v8 = vadd.f32 %v2194_v37, %v639_v2 }
 0x125   : > { %v650_v11 = vpack.c.bf16 %v640_v8, %v640_v8 }
 0x127   : > { %v864_v13 = vunpack.c.l.b16 %v650_v11 }
 0x12a   : > { %1387 = vrot.lane.b32.xlu0 %v2588_v14, %s2389_s24  ;;  %v641_v60 = vpop.f32.mrf.mxu2 }
 0x12b   : > { %v642_v9 = vadd.f32 %v2194_v37, %v641_v60  ;;  %v942_v16 = vpop.permute.xlu2 %941  ;;  %v657_v60 = vadd.s32 32, %v2664_v42 }
 0x12d   : > { %v651_v12 = vpack.c.bf16 %v642_v9, %v642_v9  ;;  %vm667_vm6 = vcmp.le.s32.totalorder %v2666_v43, %v657_v60 }
 0x12f   : > { %v865_v15 = vunpack.c.l.b16 %v651_v12  ;;  %v2719_v12 = vsel %vm667_vm6, 0.0, %v2390_v46 }
 0x132   : > { %2042 = vmatmul.msk.bf16.gmra.mxu3 %vm719_vm0, %v2588_v14  ;;  %1088 = vrot.lane.b32.xlu0 %v2639_v7, %s2387_s10  ;;  %v2644_v14 = vpack.c.b16 %v865_v15, %v864_v13  ;;  %v658_v13 = vadd.s32 40, %v2664_v42 }
 0x133   : > { %v1172_v17 = vpop.permute.xlu2 %1171 }
 0x134   : > { %890 = vmatpush.bf16.msrb.mxu0 %v2644_v14  ;;  %v1193_v51 = vsel %vm719_vm0, %v1172_v17, 0  ;;  %vm668_vm7 = vcmp.le.s32.totalorder %v2666_v43, %v658_v13 }
 0x138   : > { %891 = vmatpush.bf16.msrb.mxu0 %v2639_v7 }
 0x13a   : > { %1090 = vrot.lane.b32.xlu0 %v2644_v14, %s2387_s10 }
 0x13b   : > { %v1170_v18 = vpop.permute.xlu2 %1169 }
 0x13c   : > { %892 = vmatpush.bf16.msrb.mxu0 %v2619_v59  ;;  %v1190_v28 = vsel %vm719_vm0, %v1170_v18, 0 }
 0x140   : > { %893 = vmatpush.bf16.msrb.mxu0 %v2617_v58 }
 0x142   : > { %2043 = vmatmul.msk.bf16.gmra.mxu3 %vm719_vm0, %v698_v62 }
 0x143   : > { %v2653_v22 = vpop.permute.xlu2 %1383 }
 0x144   : > { %v950_v19 = vpop.permute.xlu1 %949 }
 0x145   : > { %v971_v29 = vsel %vm719_vm0, %v950_v19, 0 }
 0x14b   : > { %v2656_v26 = vpop.permute.xlu2 %1165 }
 0x14c   : > { %v948_v24 = vpop.permute.xlu1 %947 }
 0x14d   : > { %v968_v33 = vsel %vm719_vm0, %v948_v24, 0 }
 0x153   : > { %v1398_v31 = vpop.permute.xlu2 %1397 }
 0x154   : > { %v944_v30 = vpop.permute.xlu1 %943  ;;  %v1421_v34 = vsel %vm719_vm0, %v1398_v31, 0  ;;  %v660_v31 = vadd.s32 56, %v2664_v42 }
 0x156   : > { %vm670_vm9 = vcmp.le.s32.totalorder %v2666_v43, %v660_v31 }
 0x15c   : > { %v1396_v35 = vpop.permute.xlu1 %1395 }
 0x15d   : > { %v1418_v38 = vsel %vm719_vm0, %v1396_v35, 0  ;;  %v2755_v35 = vsel %vm670_vm9, 0.0, %v2390_v46 }
 0x164   : > { %v954_v20 = vpop.permute.xlu0 %953  ;;  %v1394_v41 = vpop.permute.xlu1 %1393 }
 0x165   : > { %v977_v21 = vsel %vm719_vm0, %v954_v20, 0  ;;  %v1415_v45 = vsel %vm719_vm0, %v1394_v41, 0  ;;  %v2731_v20 = vsel %vm668_vm7, 0.0, %v2390_v46 }
 0x166   : > { %983 = vmatpush.bf16.xpose.msrb.mxu1 %v977_v21  ;;  %v659_v21 = vadd.s32 48, %v2664_v42 }
 0x168   : > { %vm669_vm8 = vcmp.le.s32.totalorder %v2666_v43, %v659_v21 }
 0x16c   : > { %v952_v23 = vpop.permute.xlu0 %951  ;;  %v1162_v0 = vpop.permute.xlu1 %1161 }
 0x16d   : > { %v974_v25 = vsel %vm719_vm0, %v952_v23, 0 }
 0x16e   : > { %984 = vmatpush.bf16.xpose.msrb.mxu1 %v974_v25 }
 0x174   : > { %v1174_v27 = vpop.permute.xlu0 %1173  ;;  %v1386_v17 = vpop.permute.xlu1 %1385 }
 0x175   : > { %v1196_v44 = vsel %vm719_vm0, %v1174_v27, 0 }
 0x176   : > { %985 = vmatpush.bf16.xpose.msrb.mxu1 %v971_v29  ;;  %v1085_v29 = vpop.permute.xlu2 %1084 }
 0x17c   : > { %v1392_v32 = vpop.permute.xlu0 %1391  ;;  %v1087_v25 = vpop.permute.xlu1 %1086 }
 0x17d   : > { %v1412_v52 = vsel %vm719_vm0, %v1392_v32, 0 }
 0x17e   : > { %986 = vmatpush.bf16.xpose.msrb.mxu1 %v968_v33 }
 0x184   : > { %v1176_v36 = vpop.permute.xlu0 %1175 }
 0x185   : > { %2048 = vmatmul.msk.bf16.vlgmr.msrb.gmra.mxu1 %vm719_vm0, %v940_v10  ;;  %v1199_v37 = vsel %vm719_vm0, %v1176_v36, 0 }
 0x186   : > { %1427 = vmatpush.bf16.xpose.msra.mxu1 %v1421_v34  ;;  %1205 = vmatpush.bf16.xpose.msrb.mxu3 %v1199_v37 }
 0x18c   : > { %v1164_v48 = vpop.permute.xlu0 %1163 }
 0x18e   : > { %1428 = vmatpush.bf16.xpose.msra.mxu1 %v1418_v38  ;;  %1206 = vmatpush.bf16.xpose.msrb.mxu3 %v1196_v44  ;;  %v1390_v38 = vpop.permute.xlu2 %1389 }
 0x194   : > { %v946_v61 = vpop.permute.xlu0 %945 }
 0x195   : > { %v753_v50 = vpop.f32.mrf.mxu3  ;;  %2049 = vmatmul.msk.bf16.gmra.mxu1 %vm719_vm0, %v942_v16 }
 0x196   : > { %1429 = vmatpush.bf16.xpose.msra.mxu1 %v1415_v45  ;;  %v2680_v53 = vadd.f32 %v753_v50, %v2673_v47  ;;  %1207 = vmatpush.bf16.xpose.msrb.mxu3 %v1193_v51 }
 0x198   : > { %v774_v54 = vsel %vm773_vm2, %v2680_v53, -inf }
 0x199   : > { %775 = vmax.xlane.f32.xlu0 %v774_v54 }
 0x19c   : > { %v1388_v4 = vpop.permute.xlu0 %1387 }
 0x19d   : > { %v755_v57 = vpop.f32.mrf.mxu3 }
 0x19e   : > { %1430 = vmatpush.bf16.xpose.msra.mxu1 %v1412_v52  ;;  %v2691_v62 = vadd.f32 %v755_v57, %v2686_v55  ;;  %1208 = vmatpush.bf16.xpose.msrb.mxu3 %v1190_v28 }
 0x1a0   : > { %v777_v39 = vsel %vm773_vm2, %v2691_v62, -inf }
 0x1a1   : > { %778 = vmax.xlane.f32.xlu2 %v777_v39 }
 0x1a4   : > { %v1089_v10 = vpop.permute.xlu0 %1088 }
 0x1a5   : > { %v758_v2 = vpop.f32.mrf.mxu3  ;;  %2050 = vmatmul.msk.bf16.gmra.mxu1 %vm719_vm0, %v944_v30  ;;  %2056 = vmatmul.msk.bf16.vlgmr.msrb.gmra.mxu3 %vm719_vm0, %v1162_v0  ;;  %v2741_v30 = vsel %vm669_vm8, 0.0, %v2390_v46 }
 0x1a6   : > { %v2703_v3 = vadd.f32 %v758_v2, %v2697_v63 }
 0x1a8   : > { %v780_v5 = vsel %vm773_vm2, %v2703_v3, -inf }
 0x1a9   : > { %781 = vmax.xlane.f32.xlu1 %v780_v5 }
 0x1ac   : > { %v1091_v18 = vpop.permute.xlu0 %1090 }
 0x1ad   : > { %v760_v8 = vpop.f32.mrf.mxu3  ;;  %1112 = vmatpush.bf16.msrb.mxu2 %v1091_v18 }
 0x1ae   : > { %v2713_v9 = vadd.f32 %v760_v8, %v2709_v6 }
 0x1b0   : > { %v783_v11 = vsel %vm773_vm2, %v2713_v9, -inf }
 0x1b1   : > { %784 = vmax.xlane.f32.xlu2 %v783_v11  ;;  %1113 = vmatpush.bf16.msrb.mxu2 %v1089_v10 }
 0x1b5   : > { %v763_v15 = vpop.f32.mrf.mxu3  ;;  %2051 = vmatmul.msk.bf16.gmra.mxu1 %vm719_vm0, %v946_v61  ;;  %2057 = vmatmul.msk.bf16.gmra.mxu3 %vm719_vm0, %v1164_v48 }
 0x1b6   : > { %v2725_v16 = vadd.f32 %v763_v15, %v2719_v12  ;;  %1114 = vmatpush.bf16.msrb.mxu2 %v1087_v25 }
 0x1b8   : > { %v786_v19 = vsel %vm773_vm2, %v2725_v16, -inf }
 0x1b9   : > { %787 = vmax.xlane.f32.xlu0 %v786_v19 }
 0x1ba   : > { %1115 = vmatpush.bf16.msrb.mxu2 %v1085_v29 }
 0x1bd   : > { %v765_v23 = vpop.f32.mrf.mxu3 }
 0x1be   : > { %v2735_v24 = vadd.f32 %v765_v23, %v2731_v20 }
 0x1c0   : > { %v789_v27 = vsel %vm773_vm2, %v2735_v24, -inf }
 0x1c1   : > { %790 = vmax.xlane.f32.xlu0 %v789_v27 }
 0x1c5   : > { %v768_v32 = vpop.f32.mrf.mxu3  ;;  %2058 = vmatmul.msk.bf16.gmra.mxu3 %vm719_vm0, %v2656_v26  ;;  %2064 = vmatmul.msk.bf16.vlgmr.msra.gmra.mxu1 %vm719_vm0, %v2653_v22  ;;  %v1168_v22 = vpop.permute.xlu1 %1167 }
 0x1c6   : > { %v2749_v33 = vadd.f32 %v768_v32, %v2741_v30 }
 0x1c8   : > { %v792_v34 = vsel %vm773_vm2, %v2749_v33, -inf }
 0x1c9   : > { %793 = vmax.xlane.f32.xlu0 %v792_v34 }
 0x1cd   : > { %v770_v36 = vpop.f32.mrf.mxu3 }
 0x1ce   : > { %v2758_v37 = vadd.f32 %v770_v36, %v2755_v35 }
 0x1d0   : > { %v795_v26 = vsel %vm773_vm2, %v2758_v37, -inf }
 0x1d1   : > { %796 = vmax.xlane.f32.xlu2 %v795_v26 }
 0x1d5   : > { %2059 = vmatmul.msk.bf16.gmra.mxu3 %vm719_vm0, %v1168_v22  ;;  %2065 = vmatmul.msk.bf16.gmra.mxu1 %vm719_vm0, %v1386_v17 }
 0x1dd   : > { %1532 = vrot.lane.b32.xlu0 %v2639_v7, %s2389_s24 }
 0x1e5   : > { %2066 = vmatmul.msk.bf16.gmra.mxu1 %vm719_vm0, %v1388_v4 }
 0x1e9   : > { %1312 = vrot.lane.b32.xlu2 %v2644_v14, %s2388_s23 }
 0x1f5   : > { %2067 = vmatmul.msk.bf16.gmra.mxu1 %vm719_vm0, %v1390_v38 }
 0x202   : > { %v988_v40 = vpop.f32.mrf.mxu1 }
 0x203   : > { %v2771_v41 = vadd.f32 %v988_v40, %v2673_v47 }
 0x205   : > { %v1008_v42 = vsel %vm773_vm2, %v2771_v41, -inf }
 0x206   : > { %1009 = vmax.xlane.f32.xlu1 %v1008_v42 }
 0x20a   : > { %v990_v43 = vpop.f32.mrf.mxu1 }
 0x20b   : > { %v2776_v44 = vadd.f32 %v990_v43, %v2686_v55 }
 0x20c   : > { %v776_v45 = vpop.xlane.xlu0 %775 }
 0x20d   : > { %v798_v46 = vsub.f32 %v2680_v53, %v776_v45  ;;  %v1011_v48 = vsel %vm773_vm2, %v2776_v44, -inf }
 0x20f   : > { %v806_v51 = vmul.f32 1.442695, %v798_v46 }
 0x211   : > { %2195 = vpow2.f32 %v806_v51 }
 0x212   : > { %v993_v49 = vpop.f32.mrf.mxu1  ;;  %1012 = vmax.xlane.f32.xlu2 %v1011_v48 }
 0x213   : > { %v2782_v50 = vadd.f32 %v993_v49, %v2697_v63 }
 0x214   : > { %v779_v52 = vpop.xlane.xlu2 %778 }
 0x215   : > { %v799_v54 = vsub.f32 %v2691_v62, %v779_v52  ;;  %v1014_v56 = vsel %vm773_vm2, %v2782_v50, -inf }
 0x216   : > { %1015 = vmax.xlane.f32.xlu0 %v1014_v56 }
 0x217   : > { %v808_v57 = vmul.f32 1.442695, %v799_v54  ;;  %v2792_v0 = vpop.eup %2195 }
 0x219   : > { %2197 = vpow2.f32 %v808_v57 }
 0x21a   : > { %v995_v53 = vpop.f32.mrf.mxu1 }
 0x21b   : > { %v2788_v28 = vadd.f32 %v995_v53, %v2709_v6 }
 0x21c   : > { %v782_v61 = vpop.xlane.xlu1 %781 }
 0x21d   : > { %v1017_v39 = vsel %vm773_vm2, %v2788_v28, -inf  ;;  %v800_v62 = vsub.f32 %v2703_v3, %v782_v61 }
 0x21e   : > { %1018 = vmax.xlane.f32.xlu0 %v1017_v39 }
 0x21f   : > { %v2794_v1 = vpop.eup %2197  ;;  %1534 = vrot.lane.b32.xlu1 %v2644_v14, %s2389_s24  ;;  %v810_v60 = vmul.f32 1.442695, %v800_v62 }
 0x220   : > { %v846_v2 = vpack.c.bf16 %v2794_v1, %v2792_v0 }
 0x221   : > { %2199 = vpow2.f32 %v810_v60 }
 0x222   : > { %2044 = vmatmul.msk.bf16.vlgmr.msrb.gmra.mxu0 %vm773_vm2, %v846_v2  ;;  %v998_v4 = vpop.f32.mrf.mxu1 }
 0x223   : > { %v2803_v5 = vadd.f32 %v998_v4, %v2719_v12 }
 0x224   : > { %v785_v8 = vpop.xlane.xlu2 %784 }
 0x225   : > { %v801_v10 = vsub.f32 %v2713_v9, %v785_v8  ;;  %v1020_v11 = vsel %vm773_vm2, %v2803_v5, -inf }
 0x226   : > { %1021 = vmax.xlane.f32.xlu0 %v1020_v11 }
 0x227   : > { %v812_v14 = vmul.f32 1.442695, %v801_v10  ;;  %v2815_v9 = vpop.eup %2199 }
 0x228   : > { %v1210_v3 = vpop.f32.mrf.mxu3 }
 0x229   : > { %2201 = vpow2.f32 %v812_v14  ;;  %v2850_v48 = vadd.f32 %v1210_v3, %v2673_v47 }
 0x22a   : > { %v1000_v13 = vpop.f32.mrf.mxu1  ;;  %1530 = vrot.lane.b32.xlu2 %v2619_v59, %s2389_s24 }
 0x22b   : > { %v2811_v15 = vadd.f32 %v1000_v13, %v2731_v20  ;;  %v1230_v57 = vsel %vm773_vm2, %v2850_v48, -inf }
 0x22c   : > { %v788_v17 = vpop.xlane.xlu0 %787 }
 0x22d   : > { %v1023_v18 = vsel %vm773_vm2, %v2811_v15, -inf  ;;  %v802_v21 = vsub.f32 %v2725_v16, %v788_v17 }
 0x22e   : > { %1024 = vmax.xlane.f32.xlu0 %v1023_v18 }
 0x22f   : > { %v2817_v19 = vpop.eup %2201  ;;  %v814_v31 = vmul.f32 1.442695, %v802_v21 }
 0x230   : > { %v1212_v23 = vpop.f32.mrf.mxu3  ;;  %v847_v25 = vpack.c.bf16 %v2817_v19, %v2815_v9 }
 0x231   : > { %v2823_v27 = vadd.f32 %v1212_v23, %v2686_v55  ;;  %2203 = vpow2.f32 %v814_v31 }
 0x232   : > { %v1003_v29 = vpop.f32.mrf.mxu1  ;;  %1310 = vrot.lane.b32.xlu2 %v2639_v7, %s2388_s23  ;;  %2045 = vmatmul.msk.bf16.gmra.mxu0 %vm773_vm2, %v847_v25 }
 0x233   : > { %v1233_v16 = vsel %vm773_vm2, %v2823_v27, -inf  ;;  %v2832_v26 = vadd.f32 %v1003_v29, %v2741_v30 }
 0x234   : > { %v791_v32 = vpop.xlane.xlu0 %790 }
 0x235   : > { %v803_v34 = vsub.f32 %v2735_v24, %v791_v32  ;;  %v1026_v38 = vsel %vm773_vm2, %v2832_v26, -inf }
 0x236   : > { %1234 = vmax.xlane.f32.xlu0 %v1233_v16 }
 0x237   : > { %v816_v36 = vmul.f32 1.442695, %v803_v34  ;;  %v2838_v40 = vpop.eup %2203 }
 0x238   : > { %v1215_v49 = vpop.f32.mrf.mxu3 }
 0x239   : > { %2205 = vpow2.f32 %v816_v36  ;;  %v2858_v53 = vadd.f32 %v1215_v49, %v2697_v63 }
 0x23a   : > { %v1005_v22 = vpop.f32.mrf.mxu1  ;;  %1528 = vrot.lane.b32.xlu2 %v2617_v58, %s2389_s24 }
 0x23b   : > { %v2861_v61 = vadd.f32 %v1005_v22, %v2755_v35 }
 0x23c   : > { %v794_v7 = vpop.xlane.xlu0 %793 }
 0x23d   : > { %v804_v42 = vsub.f32 %v2749_v33, %v794_v7  ;;  %v1029_v60 = vsel %vm773_vm2, %v2861_v61, -inf }
 0x23e   : > { %1027 = vmax.xlane.f32.xlu0 %v1026_v38 }
 0x23f   : > { %v2840_v24 = vpop.eup %2205  ;;  %v818_v51 = vmul.f32 1.442695, %v804_v42 }
 0x240   : > { %v848_v43 = vpack.c.bf16 %v2840_v24, %v2838_v40  ;;  %v1217_v2 = vpop.f32.mrf.mxu3 }
 0x241   : > { %2207 = vpow2.f32 %v818_v51  ;;  %v2874_v10 = vadd.f32 %v1217_v2, %v2709_v6 }
 0x242   : > { %2046 = vmatmul.msk.bf16.gmra.mxu0 %vm773_vm2, %v848_v43  ;;  %v1432_v45 = vpop.f32.mrf.mxu1 }
 0x243   : > { %v2847_v46 = vadd.f32 %v1432_v45, %v2673_v47  ;;  %v1239_v14 = vsel %vm773_vm2, %v2874_v10, -inf }
 0x244   : > { %v797_v52 = vpop.xlane.xlu2 %796 }
 0x245   : > { %v805_v54 = vsub.f32 %v2758_v37, %v797_v52  ;;  %v1452_v33 = vsel %vm773_vm2, %v2847_v46, -inf  ;;  %v1236_v37 = vsel %vm773_vm2, %v2858_v53, -inf  ;;  %v822_v52 = vsel %vm773_vm2, %v2792_v0, 0.0 }
 0x246   : > { %1453 = vmax.xlane.f32.xlu0 %v1452_v33 }
 0x247   : > { %v820_v56 = vmul.f32 1.442695, %v805_v54  ;;  %v2865_v62 = vpop.eup %2207 }
 0x248   : > { %v1220_v3 = vpop.f32.mrf.mxu3 }
 0x249   : > { %2209 = vpow2.f32 %v820_v56  ;;  %1231 = vmax.xlane.f32.xlu1 %v1230_v57  ;;  %v2890_v23 = vadd.f32 %v1220_v3, %v2719_v12  ;;  %v831_v56 = vsel %vm773_vm2, %v2817_v19, 0.0 }
 0x24a   : > { %v1434_v47 = vpop.f32.mrf.mxu1 }
 0x24b   : > { %v2887_v21 = vadd.f32 %v1434_v47, %v2686_v55 }
 0x24c   : > { %v1313_v39 = vpop.permute.xlu2 %1312 }
 0x24d   : > { %1334 = vmatpush.bf16.msra.mxu0 %v1313_v39  ;;  %v1455_v29 = vsel %vm773_vm2, %v2887_v21, -inf }
 0x24e   : > { %1237 = vmax.xlane.f32.xlu0 %v1236_v37 }
 0x24f   : > { %v2867_v4 = vpop.eup %2209  ;;  %v1533_v43 = vpop.permute.xlu0 %1532 }
 0x250   : > { %v849_v8 = vpack.c.bf16 %v2867_v4, %v2865_v62  ;;  %v2894_v31 = vpop.f32.mrf.mxu3 }
 0x251   : > { %1030 = vmax.xlane.f32.xlu1 %v1029_v60 }
 0x252   : > { %2047 = vmatmul.msk.bf16.gmra.mxu0 %vm773_vm2, %v849_v8  ;;  %v2877_v11 = vpop.f32.mrf.mxu1 }
 0x256   : > { %1240 = vmax.xlane.f32.xlu0 %v1239_v14 }
 0x258   : > { %v1225_v16 = vpop.f32.mrf.mxu3 }
 0x259   : > { %v2906_v36 = vadd.f32 %v1225_v16, %v2741_v30 }
 0x25a   : > { %v1439_v13 = vpop.f32.mrf.mxu1 }
 0x25b   : > { %v2882_v17 = vadd.f32 %v1439_v13, %v2709_v6  ;;  %v1242_v6 = vsel %vm773_vm2, %v2890_v23, -inf  ;;  %v1248_v22 = vsel %vm773_vm2, %v2906_v36, -inf }
 0x25d   : > { %v1461_v18 = vsel %vm773_vm2, %v2882_v17, -inf }
 0x25e   : > { %1462 = vmax.xlane.f32.xlu0 %v1461_v18  ;;  %v2936_v18 = vadd.f32 %v2877_v11, %v2697_v63  ;;  %v2946_v11 = vadd.f32 %v2894_v31, %v2731_v20 }
 0x262   : > { %v1442_v25 = vpop.f32.mrf.mxu1 }
 0x263   : > { %1456 = vmax.xlane.f32.xlu2 %v1455_v29 }
 0x266   : > { %1243 = vmax.xlane.f32.xlu0 %v1242_v6 }
 0x26a   : > { %v1444_v32 = vpop.f32.mrf.mxu1  ;;  %1306 = vrot.lane.b32.xlu1 %v2617_v58, %s2388_s23 }
 0x26b   : > { %v2901_v55 = vadd.f32 %v1444_v32, %v2731_v20 }
 0x26d   : > { %v1467_v34 = vsel %vm773_vm2, %v2901_v55, -inf }
 0x26e   : > { %1468 = vmax.xlane.f32.xlu0 %v1467_v34 }
 0x272   : > { %v1447_v7 = vpop.f32.mrf.mxu1 }
 0x273   : > { %v2911_v38 = vadd.f32 %v1447_v7, %v2741_v30 }
 0x275   : > { %v1470_v58 = vsel %vm773_vm2, %v2911_v38, -inf }
 0x276   : > { %1249 = vmax.xlane.f32.xlu0 %v1248_v22 }
 0x279   : > { %v1010_v42 = vpop.xlane.xlu1 %1009 }
 0x27a   : > { %v1032_v45 = vsub.f32 %v2771_v41, %v1010_v42  ;;  %v2924_v41 = vadd.f32 %v1442_v25, %v2719_v12  ;;  %v1227_v42 = vpop.f32.mrf.mxu3 }
 0x27b   : > { %1308 = vrot.lane.b32.xlu2 %v2619_v59, %s2388_s23 }
 0x27c   : > { %v1040_v49 = vmul.f32 1.442695, %v1032_v45  ;;  %v1464_v60 = vsel %vm773_vm2, %v2924_v41, -inf }
 0x27e   : > { %1471 = vmax.xlane.f32.xlu0 %v1470_v58  ;;  %2211 = vpow2.f32 %v1040_v49  ;;  %v2953_v49 = vadd.f32 %v1227_v42, %v2755_v35 }
 0x284   : > { %v2212_v57 = vpop.eup %2211 }
 0x285   : > { %v1013_v51 = vpop.xlane.xlu2 %1012  ;;  %v1056_v12 = vsel %vm773_vm2, %v2212_v57, 0.0 }
 0x286   : > { %v1033_v54 = vsub.f32 %v2776_v44, %v1013_v51  ;;  %823 = vadd.xlane.f32.xlu0 %v822_v52 }
 0x288   : > { %v1042_v30 = vmul.f32 1.442695, %v1033_v54 }
 0x289   : > { %v1016_v33 = vpop.xlane.xlu0 %1015 }
 0x28a   : > { %2213 = vpow2.f32 %v1042_v30  ;;  %v1034_v44 = vsub.f32 %v2782_v50, %v1016_v33  ;;  %v825_v50 = vsel %vm773_vm2, %v2794_v1, 0.0  ;;  %v1458_v1 = vsel %vm773_vm2, %v2936_v18, -inf  ;;  %v1449_v30 = vpop.f32.mrf.mxu1 }
 0x28c   : > { %v1044_v14 = vmul.f32 1.442695, %v1034_v44 }
 0x28d   : > { %v1531_v59 = vpop.permute.xlu2 %1530 }
 0x28e   : > { %832 = vadd.xlane.f32.xlu0 %v831_v56 }
 0x290   : > { %v2214_v47 = vpop.eup %2213 }
 0x291   : > { %v1535_v39 = vpop.permute.xlu1 %1534  ;;  %v1019_v37 = vpop.xlane.xlu0 %1018  ;;  %v1080_v0 = vpack.c.bf16 %v2214_v47, %v2212_v57  ;;  %v1059_v16 = vsel %vm773_vm2, %v2214_v47, 0.0 }
 0x292   : > { %v1035_v2 = vsub.f32 %v2788_v28, %v1019_v37  ;;  %1556 = vmatpush.bf16.msra.mxu2 %v1535_v39 }
 0x293   : > { %2052 = vmatmul.msk.bf16.vlgmr.msrb.gmra.mxu2 %vm773_vm2, %v1080_v0 }
 0x294   : > { %v1046_v19 = vmul.f32 1.442695, %v1035_v2  ;;  %1465 = vmax.xlane.f32.xlu1 %v1464_v60  ;;  %v828_v2 = vsel %vm773_vm2, %v2815_v9, 0.0 }
 0x295   : > { %v1311_v8 = vpop.permute.xlu2 %1310 }
 0x296   : > { %1335 = vmatpush.bf16.msra.mxu0 %v1311_v8  ;;  %1057 = vadd.xlane.f32.xlu0 %v1056_v12  ;;  %2215 = vpow2.f32 %v1046_v19 }
 0x297   : > { %1557 = vmatpush.bf16.msra.mxu2 %v1533_v43  ;;  %2217 = vpow2.f32 %v1044_v14 }
 0x299   : > { %v1022_v3 = vpop.xlane.xlu0 %1021 }
 0x29a   : > { %v1036_v32 = vsub.f32 %v2803_v5, %v1022_v3 }
 0x29b   : > { %1558 = vmatpush.bf16.msra.mxu2 %v1531_v59  ;;  %v2967_v59 = vadd.f32 %v1449_v30, %v2755_v35 }
 0x29c   : > { %826 = vadd.xlane.f32.xlu1 %v825_v50  ;;  %v2216_v13 = vpop.eup %2215  ;;  %v1048_v63 = vmul.f32 1.442695, %v1036_v32 }
 0x29d   : > { %v1529_v28 = vpop.permute.xlu2 %1528  ;;  %v2218_v25 = vpop.eup %2217  ;;  %v1065_v58 = vsel %vm773_vm2, %v2216_v13, 0.0  ;;  %v1473_v57 = vsel %vm773_vm2, %v2967_v59, -inf }
 0x29e   : > { %v1081_v6 = vpack.c.bf16 %v2216_v13, %v2218_v25  ;;  %v1062_v39 = vsel %vm773_vm2, %v2218_v25, 0.0 }
 0x29f   : > { %1559 = vmatpush.bf16.msra.mxu2 %v1529_v28 }
 0x2a1   : > { %v1025_v29 = vpop.xlane.xlu0 %1024 }
 0x2a2   : > { %v1037_v34 = vsub.f32 %v2811_v15, %v1025_v29  ;;  %v1245_v15 = vsel %vm773_vm2, %v2946_v11, -inf }
 0x2a3   : > { %2053 = vmatmul.msk.bf16.gmra.mxu2 %vm773_vm2, %v1081_v6 }
 0x2a4   : > { %v1050_v22 = vmul.f32 1.442695, %v1037_v34  ;;  %1459 = vmax.xlane.f32.xlu2 %v1458_v1  ;;  %1060 = vadd.xlane.f32.xlu1 %v1059_v16 }
 0x2a6   : > { %2219 = vpow2.f32 %v1050_v22 }
 0x2a7   : > { %2221 = vpow2.f32 %v1048_v63 }
 0x2a9   : > { %v1235_v7 = vpop.xlane.xlu0 %1234 }
 0x2aa   : > { %v1255_v5 = vsub.f32 %v2823_v27, %v1235_v7  ;;  %v1251_v27 = vsel %vm773_vm2, %v2953_v49, -inf }
 0x2ac   : > { %v1264_v43 = vmul.f32 1.442695, %v1255_v5  ;;  %1246 = vmax.xlane.f32.xlu2 %v1245_v15  ;;  %1066 = vadd.xlane.f32.xlu1 %v1065_v58  ;;  %v2220_v45 = vpop.eup %2219 }
 0x2ad   : > { %v2955_v20 = vpop.eup %2221  ;;  %v1071_v52 = vsel %vm773_vm2, %v2220_v45, 0.0 }
 0x2ae   : > { %2223 = vpow2.f32 %v1264_v43  ;;  %v1082_v51 = vpack.c.bf16 %v2220_v45, %v2955_v20  ;;  %v1068_v15 = vsel %vm773_vm2, %v2955_v20, 0.0 }
 0x2b1   : > { %v1028_v31 = vpop.xlane.xlu0 %1027 }
 0x2b2   : > { %v1038_v37 = vsub.f32 %v2832_v26, %v1028_v31 }
 0x2b3   : > { %2054 = vmatmul.msk.bf16.gmra.mxu2 %vm773_vm2, %v1082_v51 }
 0x2b4   : > { %v2962_v54 = vpop.eup %2223  ;;  %1252 = vmax.xlane.f32.xlu2 %v1251_v27  ;;  %1072 = vadd.xlane.f32.xlu1 %v1071_v52  ;;  %v1052_v60 = vmul.f32 1.442695, %v1038_v37 }
 0x2b5   : > { %v1281_v33 = vsel %vm773_vm2, %v2962_v54, 0.0 }
 0x2b6   : > { %1282 = vadd.xlane.f32.xlu0 %v1281_v33  ;;  %2225 = vpow2.f32 %v1052_v60 }
 0x2b9   : > { %v1454_v56 = vpop.xlane.xlu0 %1453 }
 0x2ba   : > { %v1476_v6 = vsub.f32 %v2847_v46, %v1454_v56 }
 0x2bc   : > { %v1232_v47 = vpop.xlane.xlu1 %1231  ;;  %1474 = vmax.xlane.f32.xlu2 %v1473_v57  ;;  %v2226_v9 = vpop.eup %2225  ;;  %v1484_v32 = vmul.f32 1.442695, %v1476_v6 }
 0x2bd   : > { %v1254_v44 = vsub.f32 %v2850_v48, %v1232_v47  ;;  %v834_v48 = vsel %vm773_vm2, %v2838_v40, 0.0  ;;  %v1074_v33 = vsel %vm773_vm2, %v2226_v9, 0.0 }
 0x2be   : > { %1063 = vadd.xlane.f32.xlu0 %v1062_v39 }
 0x2bf   : > { %v1262_v8 = vmul.f32 1.442695, %v1254_v44 }
 0x2c1   : > { %v1238_v0 = vpop.xlane.xlu0 %1237 }
 0x2c2   : > { %v1256_v3 = vsub.f32 %v2858_v53, %v1238_v0  ;;  %v895_v0 = vpop.f32.mrf.mxu0 }
 0x2c4   : > { %v1031_v35 = vpop.xlane.xlu1 %1030  ;;  %829 = vadd.xlane.f32.xlu2 %v828_v2  ;;  %v1266_v28 = vmul.f32 1.442695, %v1256_v3 }
 0x2c5   : > { %v1039_v19 = vsub.f32 %v2861_v61, %v1031_v35 }
 0x2c7   : > { %v1054_v12 = vmul.f32 1.442695, %v1039_v19 }
 0x2c9   : > { %2227 = vpow2.f32 %v1054_v12  ;;  %v1241_v14 = vpop.xlane.xlu0 %1240 }
 0x2ca   : > { %2229 = vpow2.f32 %v1262_v8  ;;  %v1257_v26 = vsub.f32 %v2874_v10, %v1241_v14  ;;  %v897_v8 = vpop.f32.mrf.mxu0 }
 0x2cc   : > { %v1268_v50 = vmul.f32 1.442695, %v1257_v26  ;;  %835 = vadd.xlane.f32.xlu2 %v834_v48 }
 0x2ce   : > { %2231 = vpow2.f32 %v1268_v50 }
 0x2cf   : > { %v2981_v13 = vpop.eup %2227  ;;  %2233 = vpow2.f32 %v1266_v28 }
 0x2d0   : > { %v2230_v61 = vpop.eup %2229  ;;  %v1083_v25 = vpack.c.bf16 %v2981_v13, %v2226_v9  ;;  %2235 = vpow2.f32 %v1484_v32 }
 0x2d1   : > { %v2984_v29 = vpop.xlane.xlu0 %1462  ;;  %v1278_v53 = vsel %vm773_vm2, %v2230_v61, 0.0  ;;  %v1302_v51 = vpack.c.bf16 %v2962_v54, %v2230_v61 }
 0x2d2   : > { %2055 = vmatmul.msk.bf16.gmra.mxu2 %vm773_vm2, %v1083_v25  ;;  %v1479_v60 = vsub.f32 %v2882_v17, %v2984_v29 }
 0x2d4   : > { %v2232_v40 = vpop.eup %2231  ;;  %1279 = vadd.xlane.f32.xlu2 %v1278_v53  ;;  %v1490_v12 = vmul.f32 1.442695, %v1479_v60 }
 0x2d5   : > { %v1287_v10 = vsel %vm773_vm2, %v2232_v40, 0.0  ;;  %v2234_v16 = vpop.eup %2233 }
 0x2d6   : > { %v1457_v34 = vpop.xlane.xlu2 %1456  ;;  %1288 = vadd.xlane.f32.xlu0 %v1287_v10  ;;  %v1284_v7 = vsel %vm773_vm2, %v2234_v16, 0.0  ;;  %v2236_v42 = vpop.eup %2235  ;;  %v1303_v57 = vpack.c.bf16 %v2232_v40, %v2234_v16 }
 0x2d7   : > { %v1477_v1 = vsub.f32 %v2887_v21, %v1457_v34  ;;  %v1500_v39 = vsel %vm773_vm2, %v2236_v42, 0.0 }
 0x2d9   : > { %v1486_v22 = vmul.f32 1.442695, %v1477_v1  ;;  %v1244_v63 = vpop.xlane.xlu0 %1243 }
 0x2da   : > { %v1258_v46 = vsub.f32 %v2890_v23, %v1244_v63 }
 0x2db   : > { %2237 = vpow2.f32 %v1486_v22 }
 0x2dc   : > { %v1270_v5 = vmul.f32 1.442695, %v1258_v46  ;;  %1285 = vadd.xlane.f32.xlu2 %v1284_v7  ;;  %v1307_v23 = vpop.permute.xlu1 %1306  ;;  %v900_v7 = vpop.f32.mrf.mxu0 }
 0x2de   : > { %2239 = vpow2.f32 %v1270_v5  ;;  %v1309_v58 = vpop.permute.xlu2 %1308  ;;  %1069 = vadd.xlane.f32.xlu0 %v1068_v15 }
 0x2df   : > { %1336 = vmatpush.bf16.msra.mxu0 %v1309_v58 }
 0x2e1   : > { %v2995_v21 = vpop.eup %2237  ;;  %v2997_v43 = vpop.xlane.xlu0 %1468 }
 0x2e2   : > { %v1524_v45 = vpack.c.bf16 %v2995_v21, %v2236_v42 }
 0x2e3   : > { %1337 = vmatpush.bf16.msra.mxu0 %v1307_v23 }
 0x2e4   : > { %v3000_v31 = vpop.eup %2239  ;;  %2068 = vmatmul.msk.bf16.vlgmr.msra.gmra.mxu2 %vm773_vm2, %v1524_v45 }
 0x2e5   : > { %v1290_v20 = vsel %vm773_vm2, %v3000_v31, 0.0 }
 0x2e6   : > { %2060 = vmatmul.msk.bf16.vlgmr.msra.gmra.mxu0 %vm773_vm2, %v1302_v51  ;;  %1291 = vadd.xlane.f32.xlu2 %v1290_v20 }
 0x2e9   : > { %v1250_v27 = vpop.xlane.xlu0 %1249 }
 0x2ea   : > { %v1260_v52 = vsub.f32 %v2906_v36, %v1250_v27 }
 0x2ec   : > { %v1274_v30 = vmul.f32 1.442695, %v1260_v52 }
 0x2ee   : > { %2241 = vpow2.f32 %v1274_v30  ;;  %1075 = vadd.xlane.f32.xlu2 %v1074_v33  ;;  %v902_v30 = vpop.f32.mrf.mxu0  ;;  %v1077_v33 = vsel %vm773_vm2, %v2981_v13, 0.0  ;;  %v1503_v13 = vsel %vm773_vm2, %v2995_v21, 0.0 }
 0x2f1   : > { %v1472_v47 = vpop.xlane.xlu0 %1471 }
 0x2f2   : > { %v1482_v58 = vsub.f32 %v2911_v38, %v1472_v47 }
 0x2f4   : > { %v3009_v56 = vpop.eup %2241 }
 0x2f5   : > { %v1296_v54 = vsel %vm773_vm2, %v3009_v56, 0.0 }
 0x2f6   : > { %2061 = vmatmul.msk.bf16.gmra.mxu0 %vm773_vm2, %v1303_v57  ;;  %1297 = vadd.xlane.f32.xlu1 %v1296_v54 }
 0x2f9   : > { %v824_v37 = vpop.xlane.xlu0 %823 }
 0x2fa   : > { %2243 = vrcp.f32 %v824_v37 }
 0x2fe   : > { %1501 = vadd.xlane.f32.xlu1 %v1500_v39 }
 0x300   : > { %v2244_v2 = vpop.eup %2243 }
 0x301   : > { %v923_v35 = vmul.f32 %v2244_v2, %v895_v0  ;;  %v833_v16 = vpop.xlane.xlu0 %832 }
 0x303   : > { %v931_v14 = vpack.c.bf16 %v923_v35, %v923_v35 }
 0x305   : > { %v3019_v61 = vunpack.c.l.b16 %v931_v14 }
 0x307   : > { %v1466_v36 = vpop.xlane.xlu1 %1465 }
 0x308   : > { %v1480_v9 = vsub.f32 %v2924_v41, %v1466_v36  ;;  %v1481_v41 = vsub.f32 %v2901_v55, %v2997_v43 }
 0x309   : > { %v1058_v23 = vpop.xlane.xlu0 %1057 }
 0x30a   : > { %v1492_v29 = vmul.f32 1.442695, %v1480_v9  ;;  %v1494_v22 = vmul.f32 1.442695, %v1481_v41 }
 0x30f   : > { %v827_v44 = vpop.xlane.xlu1 %826 }
 0x310   : > { %2245 = vrcp.f32 %v827_v44 }
 0x311   : > { %2247 = vpow2.f32 %v1490_v12 }
 0x316   : > { %v2246_v19 = vpop.eup %2245  ;;  %v3025_v53 = vpop.f32.mrf.mxu2 }
 0x317   : > { %v924_v3 = vmul.f32 %v2246_v19, %v897_v8  ;;  %v1460_v26 = vpop.xlane.xlu2 %1459  ;;  %v1061_v47 = vpop.xlane.xlu1 %1060 }
 0x318   : > { %v1478_v48 = vsub.f32 %v2936_v18, %v1460_v26  ;;  %v3028_v18 = vpop.eup %2247  ;;  %v3055_v19 = vpop.f32.mrf.mxu0 }
 0x319   : > { %v932_v50 = vpack.c.bf16 %v924_v3, %v924_v3 }
 0x31a   : > { %v1488_v28 = vmul.f32 1.442695, %v1478_v48 }
 0x31b   : > { %v3021_v25 = vunpack.c.l.b16 %v932_v50 }
 0x31c   : > { %2249 = vpow2.f32 %v1488_v28 }
 0x31d   : > { %v1621_v17 = vpack.c.b16 %v3021_v25, %v3019_v61  ;;  %2251 = vpow2.f32 %v1492_v29 }
 0x31e   : > { %v3036_v55 = vpop.f32.mrf.mxu2 }
 0x31f   : > { %v1247_v6 = vpop.xlane.xlu2 %1246  ;;  %v1067_v26 = vpop.xlane.xlu1 %1066 }
 0x320   : > { %v1259_v40 = vsub.f32 %v2946_v11, %v1247_v6 }
 0x322   : > { %v2250_v10 = vpop.eup %2249  ;;  %v1272_v32 = vmul.f32 1.442695, %v1259_v40  ;;  %v3067_v40 = vpop.f32.mrf.mxu0 }
 0x323   : > { %v1506_v34 = vsel %vm773_vm2, %v2250_v10, 0.0  ;;  %v1525_v1 = vpack.c.bf16 %v3028_v18, %v2250_v10  ;;  %v2252_v11 = vpop.eup %2251 }
 0x324   : > { %2253 = vpow2.f32 %v1272_v32  ;;  %1507 = vadd.xlane.f32.xlu1 %v1506_v34  ;;  %v1512_v43 = vsel %vm773_vm2, %v2252_v11, 0.0 }
 0x325   : > { %2069 = vmatmul.msk.bf16.gmra.mxu2 %vm773_vm2, %v1525_v1  ;;  %2255 = vpow2.f32 %v1494_v22 }
 0x326   : > { %v1122_v54 = vpop.f32.mrf.mxu2 }
 0x327   : > { %v1253_v63 = vpop.xlane.xlu2 %1252 }
 0x328   : > { %v1261_v46 = vsub.f32 %v2953_v49, %v1253_v63  ;;  %v1496_v49 = vmul.f32 1.442695, %v1482_v58 }
 0x329   : > { %v3048_v39 = vpop.xlane.xlu0 %1282 }
 0x32a   : > { %v2254_v5 = vpop.eup %2253  ;;  %v1276_v15 = vmul.f32 1.442695, %v1261_v46 }
 0x32b   : > { %v1293_v42 = vsel %vm773_vm2, %v2254_v5, 0.0  ;;  %v1304_v45 = vpack.c.bf16 %v2254_v5, %v3000_v31  ;;  %v2256_v20 = vpop.eup %2255 }
 0x32c   : > { %2257 = vpow2.f32 %v1276_v15  ;;  %1294 = vadd.xlane.f32.xlu0 %v1293_v42  ;;  %1513 = vadd.xlane.f32.xlu1 %v1512_v43  ;;  %v1526_v57 = vpack.c.bf16 %v2256_v20, %v2252_v11  ;;  %v1515_v22 = vsel %vm773_vm2, %v2256_v20, 0.0  ;;  %v3072_v15 = vpop.f32.mrf.mxu0 }
 0x32d   : > { %2062 = vmatmul.msk.bf16.gmra.mxu0 %vm773_vm2, %v1304_v45  ;;  %2259 = vrcp.f32 %v833_v16  ;;  %v1073_v16 = vpop.xlane.xlu1 %1072 }
 0x32e   : > { %2261 = vpow2.f32 %v1496_v49  ;;  %v1124_v12 = vpop.f32.mrf.mxu2 }
 0x32f   : > { %v1475_v51 = vpop.xlane.xlu2 %1474 }
 0x330   : > { %v1483_v27 = vsub.f32 %v2967_v59, %v1475_v51 }
 0x331   : > { %v1064_v21 = vpop.xlane.xlu0 %1063 }
 0x332   : > { %v2258_v52 = vpop.eup %2257  ;;  %v1498_v38 = vmul.f32 1.442695, %v1483_v27 }
 0x333   : > { %v1299_v31 = vsel %vm773_vm2, %v2258_v52, 0.0  ;;  %v2260_v37 = vpop.eup %2259  ;;  %v1305_v60 = vpack.c.bf16 %v2258_v52, %v3009_v56  ;;  %v1509_v56 = vsel %vm773_vm2, %v3028_v18, 0.0 }
 0x334   : > { %2263 = vpow2.f32 %v1498_v38  ;;  %1078 = vadd.xlane.f32.xlu0 %v1077_v33  ;;  %1300 = vadd.xlane.f32.xlu2 %v1299_v31  ;;  %v2262_v36 = vpop.eup %2261  ;;  %v926_v44 = vmul.f32 %v2260_v37, %v902_v30  ;;  %v3077_v31 = vpop.f32.mrf.mxu0 }
 0x335   : > { %2070 = vmatmul.msk.bf16.gmra.mxu2 %vm773_vm2, %v1526_v57  ;;  %v1518_v35 = vsel %vm773_vm2, %v2262_v36, 0.0 }
 0x336   : > { %v934_v14 = vpack.c.bf16 %v926_v44, %v926_v44  ;;  %v1127_v32 = vpop.f32.mrf.mxu2 }
 0x337   : > { %v830_v59 = vpop.xlane.xlu2 %829 }
 0x338   : > { %2265 = vrcp.f32 %v830_v59  ;;  %v3062_v28 = vunpack.c.l.b16 %v934_v14 }
 0x339   : > { %2267 = vrcp.f32 %v1061_v47 }
 0x33a   : > { %v2264_v0 = vpop.eup %2263  ;;  %2269 = vrcp.f32 %v1058_v23 }
 0x33b   : > { %v1521_v2 = vsel %vm773_vm2, %v2264_v0, 0.0  ;;  %v1527_v50 = vpack.c.bf16 %v2264_v0, %v2262_v36  ;;  %2271 = vrcp.f32 %v1064_v21 }
 0x33c   : > { %1504 = vadd.xlane.f32.xlu2 %v1503_v13  ;;  %1522 = vadd.xlane.f32.xlu1 %v1521_v2  ;;  %2273 = vrcp.f32 %v1067_v26 }
 0x33d   : > { %1519 = vadd.xlane.f32.xlu0 %v1518_v35  ;;  %2063 = vmatmul.msk.bf16.gmra.mxu0 %vm773_vm2, %v1305_v60  ;;  %2275 = vrcp.f32 %v1073_v16 }
 0x33e   : > { %v2266_v8 = vpop.eup %2265  ;;  %v1129_v43 = vpop.f32.mrf.mxu2 }
 0x33f   : > { %v925_v3 = vmul.f32 %v2266_v8, %v900_v7  ;;  %v2268_v29 = vpop.eup %2267  ;;  %v3074_v23 = vpop.xlane.xlu2 %835 }
 0x340   : > { %v1146_v10 = vmul.f32 %v2268_v29, %v3036_v55  ;;  %v2270_v41 = vpop.eup %2269 }
 0x341   : > { %v933_v48 = vpack.c.bf16 %v925_v3, %v925_v3  ;;  %v1145_v18 = vmul.f32 %v2270_v41, %v3025_v53  ;;  %v2272_v63 = vpop.eup %2271 }
 0x342   : > { %v1154_v1 = vpack.c.bf16 %v1146_v10, %v1146_v10  ;;  %v1147_v7 = vmul.f32 %v2272_v63, %v1122_v54  ;;  %v2274_v5 = vpop.eup %2273 }
 0x343   : > { %v3060_v9 = vunpack.c.l.b16 %v933_v48  ;;  %v1153_v11 = vpack.c.bf16 %v1145_v18, %v1145_v18  ;;  %v1148_v58 = vmul.f32 %v2274_v5, %v1124_v12  ;;  %v2276_v49 = vpop.eup %2275 }
 0x344   : > { %1510 = vadd.xlane.f32.xlu2 %v1509_v56  ;;  %v1634_v46 = vunpack.c.l.b16 %v1154_v1  ;;  %v1155_v45 = vpack.c.bf16 %v1147_v7, %v1147_v7  ;;  %v1150_v20 = vmul.f32 %v2276_v49, %v1129_v43 }
 0x345   : > { %2071 = vmatmul.msk.bf16.gmra.mxu2 %vm773_vm2, %v1527_v50  ;;  %v1622_v6 = vpack.c.b16 %v3062_v28, %v3060_v9  ;;  %v1633_v55 = vunpack.c.l.b16 %v1153_v11  ;;  %v1156_v51 = vpack.c.bf16 %v1148_v58, %v1148_v58 }
 0x346   : > { %v1635_v27 = vunpack.c.l.b16 %v1155_v45  ;;  %v1158_v30 = vpack.c.bf16 %v1150_v20, %v1150_v20 }
 0x347   : > { %v1641_v53 = vpack.c.b16 %v1634_v46, %v1633_v55  ;;  %v1636_v38 = vunpack.c.l.b16 %v1156_v51  ;;  %v1280_v37 = vpop.xlane.xlu2 %1279 }
 0x348   : > { %v3079_v47 = vunpack.c.l.b16 %v1158_v30 }
 0x349   : > { %v1289_v34 = vpop.xlane.xlu0 %1288  ;;  %v1642_v57 = vpack.c.b16 %v1636_v38, %v1635_v27 }
 0x34c   : > { %1516 = vadd.xlane.f32.xlu2 %v1515_v22 }
 0x34f   : > { %v1286_v12 = vpop.xlane.xlu2 %1285 }
 0x351   : > { %v1070_v42 = vpop.xlane.xlu0 %1069 }
 0x352   : > { %2277 = vrcp.f32 %v1070_v42 }
 0x353   : > { %2279 = vrcp.f32 %v1280_v37 }
 0x354   : > { %2281 = vrcp.f32 %v3048_v39 }
 0x355   : > { %1645 = vrot.lane.b32.xlu1 %v1641_v53, %s2389_s24  ;;  %2283 = vrcp.f32 %v1286_v12  ;;  %v3088_v22 = vpop.f32.mrf.mxu2 }
 0x356   : > { %2285 = vrcp.f32 %v1289_v34  ;;  %v843_v34 = vsel %vm773_vm2, %v2867_v4, 0.0 }
 0x358   : > { %v2278_v52 = vpop.eup %2277 }
 0x359   : > { %v1149_v33 = vmul.f32 %v2278_v52, %v1127_v32  ;;  %v2280_v44 = vpop.eup %2279  ;;  %v1292_v11 = vpop.xlane.xlu2 %1291 }
 0x35a   : > { %v2282_v2 = vpop.eup %2281  ;;  %2287 = vrcp.f32 %v1292_v11 }
 0x35b   : > { %v1157_v54 = vpack.c.bf16 %v1149_v33, %v1149_v33  ;;  %v2284_v56 = vpop.eup %2283 }
 0x35c   : > { %v2286_v29 = vpop.eup %2285 }
 0x35d   : > { %1647 = vrot.lane.b32.xlu1 %v1642_v57, %s2389_s24  ;;  %v3082_v59 = vunpack.c.l.b16 %v1157_v54  ;;  %v3091_v63 = vpop.f32.mrf.mxu2 }
 0x35f   : > { %v1643_v36 = vpack.c.b16 %v3079_v47, %v3082_v59  ;;  %v2140_v59 = vld [vmem:[%s3204_s7 + $0x10] sm:$0xff] }
 0x360   : > { %v2288_v49 = vpop.eup %2287 }
 0x361   : > { %v3095_v5 = vpop.xlane.xlu2 %1075 }
 0x363   : > { %v1339_v0 = vpop.f32.mrf.mxu0 }
 0x364   : > { %v1367_v13 = vmul.f32 %v2280_v44, %v1339_v0 }
 0x366   : > { %v1375_v35 = vpack.c.bf16 %v1367_v13, %v1367_v13 }
 0x367   : > { %v1561_v46 = vpop.f32.mrf.mxu2 }
 0x368   : > { %v1661_v3 = vunpack.c.l.b16 %v1375_v35 }
 0x369   : > { %v1298_v7 = vpop.xlane.xlu1 %1297 }
 0x36b   : > { %v1341_v60 = vpop.f32.mrf.mxu0 }
 0x36c   : > { %v1368_v8 = vmul.f32 %v2282_v2, %v1341_v60 }
 0x36e   : > { %v1376_v14 = vpack.c.bf16 %v1368_v8, %v1368_v8 }
 0x36f   : > { %v1563_v55 = vpop.f32.mrf.mxu2 }
 0x370   : > { %v1662_v26 = vunpack.c.l.b16 %v1376_v14 }
 0x371   : > { %v1502_v58 = vpop.xlane.xlu1 %1501 }
 0x372   : > { %v1669_v21 = vpack.c.b16 %v1662_v26, %v1661_v3  ;;  %2289 = vrcp.f32 %v1502_v58 }
 0x373   : > { %v1344_v48 = vpop.f32.mrf.mxu0 }
 0x374   : > { %1673 = vrot.lane.b32.xlu2 %v1669_v21, %s2388_s23  ;;  %v1369_v50 = vmul.f32 %v2284_v56, %v1344_v48 }
 0x376   : > { %v1377_v10 = vpack.c.bf16 %v1369_v50, %v1369_v50 }
 0x378   : > { %v1663_v18 = vunpack.c.l.b16 %v1377_v10  ;;  %v2290_v27 = vpop.eup %2289 }
 0x379   : > { %v1589_v54 = vmul.f32 %v2290_v27, %v1561_v46 }
 0x37b   : > { %v1346_v39 = vpop.f32.mrf.mxu0  ;;  %v1597_v35 = vpack.c.bf16 %v1589_v54, %v1589_v54 }
 0x37c   : > { %v1370_v41 = vmul.f32 %v2286_v29, %v1346_v39 }
 0x37d   : > { %v1689_v56 = vunpack.c.l.b16 %v1597_v35  ;;  %v840_v35 = vsel %vm773_vm2, %v2865_v62, 0.0 }
 0x37e   : > { %v1378_v32 = vpack.c.bf16 %v1370_v41, %v1370_v41 }
 0x380   : > { %v1664_v1 = vunpack.c.l.b16 %v1378_v32 }
 0x382   : > { %v1670_v16 = vpack.c.b16 %v1664_v1, %v1663_v18 }
 0x384   : > { %1675 = vrot.lane.b32.xlu1 %v1670_v16, %s2388_s23 }
 0x397   : > { %v1508_v4 = vpop.xlane.xlu1 %1507 }
 0x39d   : > { %844 = vadd.xlane.f32.xlu2 %v843_v34 }
 0x39f   : > { %v1295_v53 = vpop.xlane.xlu0 %1294  ;;  %v1514_v41 = vpop.xlane.xlu1 %1513 }
 0x3a0   : > { %2291 = vrcp.f32 %v1295_v53 }
 0x3a6   : > { %v2292_v38 = vpop.eup %2291 }
 0x3a7   : > { %v1301_v42 = vpop.xlane.xlu2 %1300  ;;  %v1079_v12 = vpop.xlane.xlu0 %1078 }
 0x3a8   : > { %v1566_v43 = vpop.f32.mrf.mxu2 }
 0x3aa   : > { %v1349_v45 = vpop.f32.mrf.mxu0 }
 0x3ab   : > { %v1371_v51 = vmul.f32 %v2288_v49, %v1349_v45 }
 0x3ad   : > { %v1379_v33 = vpack.c.bf16 %v1371_v51, %v1371_v51 }
 0x3af   : > { %v1505_v20 = vpop.xlane.xlu2 %1504  ;;  %v1665_v44 = vunpack.c.l.b16 %v1379_v33 }
 0x3b0   : > { %2293 = vrcp.f32 %v1505_v20  ;;  %v1568_v52 = vpop.f32.mrf.mxu2 }
 0x3b1   : > { %2295 = vrcp.f32 %v1508_v4 }
 0x3b2   : > { %v1351_v30 = vpop.f32.mrf.mxu0  ;;  %2297 = vrcp.f32 %v1298_v7 }
 0x3b3   : > { %v1372_v57 = vmul.f32 %v2292_v38, %v1351_v30 }
 0x3b5   : > { %v1380_v37 = vpack.c.bf16 %v1372_v57, %v1372_v57 }
 0x3b6   : > { %v2294_v0 = vpop.eup %2293 }
 0x3b7   : > { %v1666_v13 = vunpack.c.l.b16 %v1380_v37  ;;  %v1511_v2 = vpop.xlane.xlu2 %1510  ;;  %v1590_v60 = vmul.f32 %v2294_v0, %v1563_v55  ;;  %v2296_v26 = vpop.eup %2295 }
 0x3b8   : > { %2299 = vrcp.f32 %v1511_v2  ;;  %v3097_v8 = vpop.f32.mrf.mxu2  ;;  %v1591_v48 = vmul.f32 %v2296_v26, %v1566_v43  ;;  %v2298_v29 = vpop.eup %2297  ;;  %v837_v2 = vsel %vm773_vm2, %v2840_v24, 0.0  ;;  %v2144_v24 = vld [vmem:[%s3204_s7 + $0x30] sm:$0xff] }
 0x3b9   : > { %v1671_v14 = vpack.c.b16 %v1666_v13, %v1665_v44  ;;  %v1598_v3 = vpack.c.bf16 %v1590_v60, %v1590_v60  ;;  %2301 = vrcp.f32 %v1301_v42  ;;  %v1520_v55 = vpop.xlane.xlu0 %1519  ;;  %v1523_v42 = vpop.xlane.xlu1 %1522 }
 0x3ba   : > { %v1354_v21 = vpop.f32.mrf.mxu0  ;;  %v1599_v32 = vpack.c.bf16 %v1591_v48, %v1591_v48  ;;  %2303 = vrcp.f32 %v1520_v55 }
 0x3bb   : > { %1677 = vrot.lane.b32.xlu2 %v1671_v14, %s2388_s23  ;;  %v1690_v50 = vunpack.c.l.b16 %v1598_v3  ;;  %v1373_v18 = vmul.f32 %v2298_v29, %v1354_v21  ;;  %2305 = vrcp.f32 %v1523_v42  ;;  %v2145_v3 = vld [vmem:[%s3204_s7 + $0x38] sm:$0xff] }
 0x3bc   : > { %v1691_v7 = vunpack.c.l.b16 %v1599_v32  ;;  %1806 = vmatpush.bf16.msra.mxu3 %v2145_v3 }
 0x3bd   : > { %v1697_v39 = vpack.c.b16 %v1690_v50, %v1689_v56  ;;  %v1381_v58 = vpack.c.bf16 %v1373_v18, %v1373_v18 }
 0x3be   : > { %v2300_v10 = vpop.eup %2299 }
 0x3bf   : > { %1701 = vrot.lane.b32.xlu0 %v1697_v39, %s2387_s10  ;;  %v1592_v1 = vmul.f32 %v2300_v10, %v1568_v52  ;;  %v2302_v46 = vpop.eup %2301  ;;  %v1667_v51 = vunpack.c.l.b16 %v1381_v58  ;;  %v1517_v60 = vpop.xlane.xlu2 %1516 }
 0x3c0   : > { %v1573_v16 = vpop.f32.mrf.mxu2  ;;  %v2304_v52 = vpop.eup %2303  ;;  %2307 = vrcp.f32 %v1517_v60  ;;  %1807 = vmatpush.bf16.msra.mxu3 %v2144_v24 }
 0x3c1   : > { %v1600_v11 = vpack.c.bf16 %v1592_v1, %v1592_v1  ;;  %v2306_v30 = vpop.eup %2305  ;;  %2309 = vrcp.f32 %v1514_v41 }
 0x3c2   : > { %v1356_v34 = vpop.f32.mrf.mxu0  ;;  %2311 = vrcp.f32 %v1079_v12  ;;  %v2143_v12 = vld [vmem:[%s3204_s7 + $0x28] sm:$0xff] }
 0x3c3   : > { %v1374_v43 = vmul.f32 %v2302_v46, %v1356_v34  ;;  %v1692_v53 = vunpack.c.l.b16 %v1600_v11  ;;  %2313 = vrcp.f32 %v3095_v5  ;;  %v2138_v11 = vld [vmem:[%s3204_s7] sm:$0xff] }
 0x3c4   : > { %1808 = vmatpush.bf16.msra.mxu3 %v2143_v12 }
 0x3c5   : > { %v1382_v45 = vpack.c.bf16 %v1374_v43, %v1374_v43  ;;  %v1698_v49 = vpack.c.b16 %v1692_v53, %v1691_v7 }
 0x3c6   : > { %v2308_v14 = vpop.eup %2307 }
 0x3c7   : > { %v1668_v20 = vunpack.c.l.b16 %v1382_v45  ;;  %1703 = vrot.lane.b32.xlu1 %v1698_v49, %s2387_s10  ;;  %v1594_v26 = vmul.f32 %v2308_v14, %v1573_v16  ;;  %v2310_v21 = vpop.eup %2309  ;;  %v1646_v46 = vpop.permute.xlu1 %1645 }
 0x3c8   : > { %v1576_v27 = vpop.f32.mrf.mxu2  ;;  %v2312_v48 = vpop.eup %2311  ;;  %v1593_v62 = vmul.f32 %v2310_v21, %v3097_v8  ;;  %v2142_v8 = vld [vmem:[%s3204_s7 + $0x20] sm:$0xff]  ;;  %v1711_v55 = vsel %vm719_vm0, %v1621_v17, %v1646_v46 }
 0x3c9   : > { %v1672_v4 = vpack.c.b16 %v1668_v20, %v1667_v51  ;;  %v1595_v38 = vmul.f32 %v2304_v52, %v1576_v27  ;;  %v2314_v56 = vpop.eup %2313  ;;  %v1602_v50 = vpack.c.bf16 %v1594_v26, %v1594_v26  ;;  %v1152_v29 = vmul.f32 %v2312_v48, %v3091_v63  ;;  %1809 = vmatpush.bf16.msra.mxu3 %v2142_v8  ;;  %v2141_v63 = vld [vmem:[%s3204_s7 + $0x18] sm:$0xff] }
 0x3ca   : > { %v1601_v5 = vpack.c.bf16 %v1593_v62, %v1593_v62  ;;  %v1151_v39 = vmul.f32 %v2314_v56, %v3088_v22  ;;  %v2139_v22 = vld [vmem:[%s3204_s7 + $0x8] sm:$0xff] }
 0x3cb   : > { %v1603_v57 = vpack.c.bf16 %v1595_v38, %v1595_v38  ;;  %v1694_v10 = vunpack.c.l.b16 %v1602_v50  ;;  %v1160_v41 = vpack.c.bf16 %v1152_v29, %v1152_v29 }
 0x3cc   : > { %v1693_v32 = vunpack.c.l.b16 %v1601_v5  ;;  %v1159_v18 = vpack.c.bf16 %v1151_v39, %v1151_v39 }
 0x3cd   : > { %v1695_v0 = vunpack.c.l.b16 %v1603_v57  ;;  %v1640_v16 = vunpack.c.l.b16 %v1160_v41  ;;  %1810 = vmatpush.bf16.msra.mxu3 %v2141_v63 }
 0x3ce   : > { %v1699_v1 = vpack.c.b16 %v1694_v10, %v1693_v32  ;;  %v1639_v47 = vunpack.c.l.b16 %v1159_v18  ;;  %v1674_v34 = vpop.permute.xlu2 %1673 }
 0x3cf   : > { %v1648_v7 = vpop.permute.xlu1 %1647  ;;  %v1722_v58 = vsel %vm773_vm2, %v1711_v55, %v1674_v34 }
 0x3d0   : > { %v1578_v33 = vpop.f32.mrf.mxu2  ;;  %v1714_v42 = vsel %vm719_vm0, %v1622_v6, %v1648_v7 }
 0x3d1   : > { %v1596_v54 = vmul.f32 %v2306_v30, %v1578_v33  ;;  %1811 = vmatpush.bf16.msra.mxu3 %v2140_v59 }
 0x3d3   : > { %v1604_v37 = vpack.c.bf16 %v1596_v54, %v1596_v54 }
 0x3d5   : > { %v1696_v44 = vunpack.c.l.b16 %v1604_v37  ;;  %1812 = vmatpush.bf16.msra.mxu3 %v2139_v22 }
 0x3d7   : > { %v1700_v13 = vpack.c.b16 %v1696_v44, %v1695_v0 }
 0x3d9   : > { %1707 = vrot.lane.b32.xlu2 %v1700_v13, %s2387_s10  ;;  %1813 = vmatpush.bf16.msra.mxu3 %v2138_v11 }
 0x3e9   : > { %838 = vadd.xlane.f32.xlu0 %v837_v2 }
 0x3f1   : > { %841 = vadd.xlane.f32.xlu1 %v840_v35 }
 0x3f6   : > { %v1676_v45 = vpop.permute.xlu1 %1675 }
 0x3f7   : > { %v1724_v51 = vsel %vm773_vm2, %v1714_v42, %v1676_v45 }
 0x3fd   : > { %1649 = vrot.lane.b32.xlu0 %v1643_v36, %s2389_s24  ;;  %v1644_v36 = vpack.c.b16 %v1640_v16, %v1639_v47 }
 0x405   : > { %1705 = vrot.lane.b32.xlu0 %v1699_v1, %s2387_s10  ;;  %s296_s10 = sand.u32 1, %s2377_s28  }
 0x406   : > { %s1844_s17 = scalar_lea.sflag [#allocation3], %s296_s10 }
 0x40a   : > { %1651 = vrot.lane.b32.xlu1 %v1644_v36, %s2389_s24 }
 0x40d   : > { %1679 = vrot.lane.b32.xlu0 %v1672_v4, %s2388_s23  ;;  %s1925_s23 = sshll.u32 %s296_s10, 6 }
 0x40e   : > { %s298_s24 = scalar_lea.vmem [#allocation2], %s1925_s23  ;;  %s2343_s23 = scalar_lea.hbm %s3205_s8, 256 }
 0x40f   : > { %s1856_s12 = sshll.u32 %s298_s24, 4  ;;  %p2345_p1 = scmp.lt.s32.totalorder %s2343_s23, %s2339_s19  ;;  %s1857_s12 = int_to_ptr.vmem [resolvable:$true] %s1856_s12 }
 0x410   : > { %v845_v28 = vpop.xlane.xlu2 %844 }
 0x411   : > { %p2346_p2 = por %p2345_p1, %p2344_p0 }
 0x413   : > { %p2347_p3 = pnand %p2346_p2, %p2342_p13 }
 0x418   : > { %v1678_v0 = vpop.permute.xlu2 %1677 }
 0x431   : > { %v1702_v43 = vpop.permute.xlu0 %1701 }
 0x432   : > { %v1731_v53 = vsel %vm1729_vm10, %v1722_v58, %v1702_v43 }
 0x433   : > { %1814 = vmatmul.bf16.vlgmr.msra.gmra.mxu3 %v1731_v53  ;;  %v1708_v62 = vpop.permute.xlu2 %1707 }
 0x439   : > { %v1704_v49 = vpop.permute.xlu1 %1703 }
 0x43a   : > { %v1734_v20 = vsel %vm1729_vm10, %v1724_v51, %v1704_v49 }
 0x443   : > { %1819 = vmatmul.bf16.gmra.mxu3 %v1734_v20 }
 0x45c   : > { %v839_v61 = vpop.xlane.xlu0 %838 }
 0x45d   : > { %2315 = vrcp.f32 %v839_v61 }
 0x45e   : > { %2317 = vrcp.f32 %v3074_v23 }
 0x463   : > { %v2316_v25 = vpop.eup %2315 }
 0x464   : > { %v2318_v17 = vpop.eup %2317  ;;  %v928_v27 = vmul.f32 %v2316_v25, %v3067_v40  ;;  %v842_v38 = vpop.xlane.xlu1 %841 }
 0x465   : > { %v927_v4 = vmul.f32 %v2318_v17, %v3055_v19  ;;  %2319 = vrcp.f32 %v842_v38 }
 0x466   : > { %v936_v52 = vpack.c.bf16 %v928_v27, %v928_v27  ;;  %2321 = vrcp.f32 %v845_v28 }
 0x467   : > { %v935_v9 = vpack.c.bf16 %v927_v4, %v927_v4 }
 0x468   : > { %v1618_v6 = vunpack.c.l.b16 %v936_v52 }
 0x469   : > { %v1617_v33 = vunpack.c.l.b16 %v935_v9 }
 0x46b   : > { %v1623_v57 = vpack.c.b16 %v1618_v6, %v1617_v33  ;;  %v2320_v54 = vpop.eup %2319 }
 0x46c   : > { %v2322_v23 = vpop.eup %2321  ;;  %v929_v44 = vmul.f32 %v2320_v54, %v3072_v15 }
 0x46d   : > { %v930_v13 = vmul.f32 %v2322_v23, %v3077_v31 }
 0x46e   : > { %v937_v60 = vpack.c.bf16 %v929_v44, %v929_v44 }
 0x46f   : > { %v1650_v30 = vpop.permute.xlu0 %1649  ;;  %v938_v35 = vpack.c.bf16 %v930_v13, %v930_v13 }
 0x470   : > { %v1717_v37 = vsel %vm719_vm0, %v1623_v57, %v1650_v30  ;;  %v1619_v14 = vunpack.c.l.b16 %v937_v60 }
 0x471   : > { %v1726_v19 = vsel %vm773_vm2, %v1717_v37, %v1678_v0  ;;  %v1620_v3 = vunpack.c.l.b16 %v938_v35 }
 0x473   : > { %v1624_v21 = vpack.c.b16 %v1620_v3, %v1619_v14 }
 0x477   : > { %v1706_v40 = vpop.permute.xlu0 %1705 }
 0x478   : > { %v1737_v2 = vsel %vm1729_vm10, %v1726_v19, %v1706_v40 }
 0x479   : > { %1824 = vmatmul.bf16.gmra.mxu3 %v1737_v2 }
 0x47c   : > { %v1652_v26 = vpop.permute.xlu1 %1651 }
 0x47d   : > { %v1720_v48 = vsel %vm719_vm0, %v1624_v21, %v1652_v26 }
 0x47f   : > { %v1680_v24 = vpop.permute.xlu0 %1679 }
 0x480   : > { %v1728_v15 = vsel %vm773_vm2, %v1720_v48, %v1680_v24 }
 0x481   : > { %v1740_v12 = vsel %vm1729_vm10, %v1728_v15, %v1708_v62 }
 0x489   : > { %1829 = vmatmul.bf16.gmra.mxu3 %v1740_v12 }
 0x4b6   : > { %v1815_v31 = vpop.f32.mrf.mxu3 }
 0x4b7   : > { %1835 = vst [vmem:[%s298_s24] sm:$0xff] %v1815_v31 }
 0x4be   : > { %v1817_v56 = vpop.f32.mrf.mxu3 }
 0x4bf   : > { %1836 = vst [vmem:[%s298_s24 + $0x8] sm:$0xff] %v1817_v56 }
 0x4c6   : > { %v1820_v50 = vpop.f32.mrf.mxu3 }
 0x4c7   : > { %1837 = vst [vmem:[%s298_s24 + $0x10] sm:$0xff] %v1820_v50 }
 0x4ce   : > { %v1822_v29 = vpop.f32.mrf.mxu3 }
 0x4cf   : > { %1838 = vst [vmem:[%s298_s24 + $0x18] sm:$0xff] %v1822_v29 }
 0x4fc   : > { %v1825_v5 = vpop.f32.mrf.mxu3 }
 0x4fd   : > { %1839 = vst [vmem:[%s298_s24 + $0x20] sm:$0xff] %v1825_v5 }
 0x504   : > { %v1827_v39 = vpop.f32.mrf.mxu3 }
 0x505   : > { %1840 = vst [vmem:[%s298_s24 + $0x28] sm:$0xff] %v1827_v39 }
 0x50c   : > { %v1830_v8 = vpop.f32.mrf.mxu3 }
 0x50d   : > { %1841 = vst [vmem:[%s298_s24 + $0x30] sm:$0xff] %v1830_v8 }
 0x514   : > { %v1832_v10 = vpop.f32.mrf.mxu3 }
 0x515   : > { %1842 = vst [vmem:[%s298_s24 + $0x38] sm:$0xff] %v1832_v10 }
 0x516   : > { %2350 = shalt.err (!%p2347_p3)
}
 0x517   : > { %s2391_s10 = smov 128   ;;  %s2392_s24 = smov 8  }
 0x518   : > { %2147 = dma.vmem_to_hbm [thread:$0]  (%p2476_p5), %s1857_s12, 1024, %s1859_s13, %s1844_s17, %s2391_s10, %s2391_s10, %s2392_s24  }
 0x519 PF: > { %p2153_p4 = scmp.ge.s32.totalorder %s2385_s30, 2  ;;  %s1873_s25 = sand.u32 1, %s2373_s27  }
 0x51a   : > { %s1874_s26 = scalar_lea.sflag [#allocation3], %s1873_s25 }
 0x51b   : > { %p2150_p7 = pnand %p2153_p4, %p2480_p6 }
 0x51d   : > { %p2151_p8 = pneg %p2150_p7 }
 0x51f   : > { %2368 = dma.done.wait (%p2151_p8), %s1874_s26, 1024  }
 0x520   : > { %2370 = vsyncadd (%p2151_p8), %s1874_s26, 4294966272  ;;  %p18_p9 = scmp.ge.s32.totalorder %s2463_s11, 6   ;;  %s3208_s27 = smov %s2377_s28 }
 0x521   : > { %s3209_s28 = smov %s2381_s29  ;;  %s3210_s29 = smov %s2474_s14 }
 0x522   : > { %s3211_s30 = smov %s2463_s11  ;;  %20 = sbr.rel (!%p18_p9) target bundleno = 3 (0x3), region = 87 }
 0x527   :  { %1880 = vsyncpa [#allocation3], 1 }
 0x528   :  { %1882 = vsyncpa [#allocation3 + $0x1], 1 }

</bundles_post_ra>
